<compile_context>
chip_gen: v7x
topology: tpu7x:2x2x1
jax: 0.10.0
libtpu: 0.0.40
codegen_flags: <defaults>
</compile_context>

<pallas_src>
import numpy as np
import jax
import jax.numpy as jnp
from jax.experimental import pallas as pl
from jax.experimental.pallas import tpu as pltpu


# ----------------------------- Pallas kernel --------------------------------

def _softplus(x):
    # Numerically stable softplus; log1p keeps it to a single EUP op.
    return jnp.maximum(x, 0.0) + jnp.log1p(jnp.exp(-jnp.abs(x)))


def _make_kernel(cin):
    def kernel(x_ref, w1_ref, b1_ref, w2_ref, b2_ref, w3_ref, b3_ref, o_ref):
        """Fused 1x1-conv MLP over a tile of pixels (pixels on the lane axis).

        x_ref : (Cin, TM) f32   input channels x pixels   (lane-dense)
        w1_ref: (H1, Cin) f32
        b1_ref: (H1, 1)   f32
        w2_ref: (H1, H1)  bf16  (MXU operand)
        b2_ref: (H1, 1)   f32
        w3_ref: (CP, H1)  bf16  (MXU operand; CP = c_out padded to 8 sublanes)
        b3_ref: (CP, 1)   f32
        o_ref : (CP, TM)  f32   output channels x pixels   (lane-dense)
        """
        x = x_ref[...]
        w1 = w1_ref[...]

        # Layer 1: contraction dim is Cin (tiny, static) -> Cin VPU
        # broadcast-FMAs instead of a padded K=Cin MXU pass.
        h = w1[:, 0:1] * x[0:1, :]
        for k in range(1, cin):
            h = h + w1[:, k:k + 1] * x[k:k + 1, :]
        h = _softplus(h + b1_ref[...])

        # Layer 2: 128-deep contraction on the MXU, bf16 operands, f32 accum.
        h = jnp.dot(w2_ref[...], h.astype(jnp.bfloat16),
                    preferred_element_type=jnp.float32)
        h = _softplus(h + b2_ref[...])

        # Layer 3: (CP, H1) @ (H1, TM) -> (CP, TM).  Output block stays
        # lane-dense; writeback is CP(=8) rows, not a 128-wide padded slab.
        o_ref[...] = (jnp.dot(w3_ref[...], h.astype(jnp.bfloat16),
                              preferred_element_type=jnp.float32)
                      + b3_ref[...])

    return kernel


# ------------------------------- wrapper -------------------------------------

def _round_up(a, b):
    return ((a + b - 1) // b) * b


def cnn_forward(x, params, *, tile_m=2048):
    """Forward pass of the CNN.  x: (B, c_in, H, W) NCHW -> (B, c_out, H, W)."""
    (w1, b1), (w2, b2), (w3, b3) = params["c1"], params["c2"], params["c3"]
    B, Cin, H, W = x.shape
    H1 = w1.shape[0]            # n_hidden * c_in
    Cout = w3.shape[0]

    M = B * H * W
    CP = max(8, _round_up(Cout, 8))          # out channels padded to sublanes

    # Pixel-tile size: multiple of 128 (lane-dense), big (amortize per-step
    # overhead), but keep >= 2 grid steps when possible so v7x's two
    # TensorCores both get work on the "parallel" axis.
    tm_cap = max(128, (tile_m // 128) * 128)
    if M <= 128:
        tm = 128
    else:
        tm = min(tm_cap, _round_up((M + 1) // 2, 128))
    Mp = _round_up(M, tm)

    # 1x1 convs == per-pixel channel matmuls; pixels-on-lanes layout (glue).
    xm = jnp.transpose(x, (1, 0, 2, 3)).reshape(Cin, M)
    if Mp != M:
        xm = jnp.pad(xm, ((0, 0), (0, Mp - M)))
    xm = xm.astype(jnp.float32)

    # PyTorch conv weight (O, I, 1, 1) -> (O, I) matmul operands.
    w1m = w1.reshape(H1, Cin).astype(jnp.float32)                 # VPU layer
    b1m = b1.reshape(H1, 1).astype(jnp.float32)
    w2m = w2.reshape(H1, H1).astype(jnp.bfloat16)                 # MXU operand
    b2m = b2.reshape(H1, 1).astype(jnp.float32)
    w3m = jnp.pad(w3.reshape(Cout, H1),
                  ((0, CP - Cout), (0, 0))).astype(jnp.bfloat16)  # MXU operand
    b3m = jnp.pad(b3.reshape(Cout, 1),
                  ((0, CP - Cout), (0, 0))).astype(jnp.float32)

    grid = (Mp // tm,)
    flops = 2 * Mp * (Cin * H1 + H1 * H1 + H1 * CP)
    transcendentals = 4 * Mp * H1            # exp + log, two softplus layers
    bytes_accessed = (4 * Mp * Cin            # x (f32)
                      + 4 * H1 * Cin          # w1 (f32)
                      + 2 * H1 * H1           # w2 (bf16)
                      + 2 * CP * H1           # w3 (bf16)
                      + 4 * (2 * H1 + CP)     # biases
                      + 4 * CP * Mp)          # output (f32)
    cost = pl.CostEstimate(flops=flops, transcendentals=transcendentals,
                           bytes_accessed=bytes_accessed)

    out = pl.pallas_call(
        _make_kernel(Cin),
        out_shape=jax.ShapeDtypeStruct((CP, Mp), jnp.float32),
        grid=grid,
        in_specs=[
            pl.BlockSpec((Cin, tm), lambda i: (0, i)),   # pixels (tiled)
            pl.BlockSpec((H1, Cin), lambda i: (0, 0)),   # weights/biases:
            pl.BlockSpec((H1, 1), lambda i: (0, 0)),     # constant blocks ->
            pl.BlockSpec((H1, H1), lambda i: (0, 0)),    # stay resident in
            pl.BlockSpec((H1, 1), lambda i: (0, 0)),     # VMEM across steps
            pl.BlockSpec((CP, H1), lambda i: (0, 0)),
            pl.BlockSpec((CP, 1), lambda i: (0, 0)),
        ],
        out_specs=pl.BlockSpec((CP, tm), lambda i: (0, i)),
        compiler_params=pltpu.CompilerParams(
            dimension_semantics=("parallel",)),          # v7x: shard over 2 TCs
        cost_estimate=cost,
    )(xm, w1m, b1m, w2m, b2m, w3m, b3m)

    y = out[:Cout, :M].reshape(Cout, B, H, W)            # glue: drop padding
    return jnp.transpose(y, (1, 0, 2, 3))                # back to NCHW


# ------------------------------ parameters -----------------------------------

def init_params(key, c_in, c_out=2, n_hidden=32):
    """Matches nn.Conv2d default init; last conv weight & bias zeroed."""
    hid = n_hidden * c_in

    def conv_init(k, cin, cout):
        k1, k2 = jax.random.split(k)
        bound = 1.0 / np.sqrt(cin)          # fan_in = cin * 1 * 1
        w = jax.random.uniform(k1, (cout, cin, 1, 1), jnp.float32, -bound, bound)
        b = jax.random.uniform(k2, (cout,), jnp.float32, -bound, bound)
        return w, b

    k1, k2, _ = jax.random.split(key, 3)
    return {
        "c1": conv_init(k1, c_in, hid),
        "c2": conv_init(k2, hid, hid),
        # self.net[-1].weight.data.zero_(); self.net[-1].bias.data.zero_()
        "c3": (jnp.zeros((c_out, hid, 1, 1), jnp.float32),
               jnp.zeros((c_out,), jnp.float32)),
    }


# --------------------------- pure-JAX reference ------------------------------

def _conv1x1_ref(x, w, b):
    y = jax.lax.conv_general_dilated(
        x, w, (1, 1), "VALID", dimension_numbers=("NCHW", "OIHW", "NCHW"),
        precision=jax.lax.Precision.HIGHEST)
    return y + b[None, :, None, None]


def _forward_ref(x, params):
    h = jax.nn.softplus(_conv1x1_ref(x, *params["c1"]))
    h = jax.nn.softplus(_conv1x1_ref(h, *params["c2"]))
    return _conv1x1_ref(h, *params["c3"])


# --------------------------------- main ---------------------------------------

if __name__ == "__main__":
    c_in, c_out, n_hidden = 4, 2, 32          # hidden = n_hidden * c_in = 128
    B, S = 2, 16

    key = jax.random.PRNGKey(0)
    kx, kp = jax.random.split(key)
    x = jax.random.normal(kx, (B, c_in, S, S), jnp.float32)
    params = init_params(kp, c_in, c_out, n_hidden)

    fwd = jax.jit(lambda xx: cnn_forward(xx, params))
    out = fwd(x)
    jax.block_until_ready(out)

    assert out.shape == (B, c_out, S, S)
    ref = _forward_ref(x, params)              # zero final layer -> all zeros
    np.testing.assert_allclose(np.asarray(out), np.asarray(ref),
                               rtol=2e-2, atol=2e-2)

    # Extra check with a non-zero final layer so the full matmul+softplus path
    # (including the bf16 MXU operands) is exercised numerically.
    hid = n_hidden * c_in
    k3w, k3b = jax.random.split(jax.random.PRNGKey(1))
    bound = 1.0 / np.sqrt(hid)
    params_nz = dict(params)
    params_nz["c3"] = (
        jax.random.uniform(k3w, (c_out, hid, 1, 1), jnp.float32, -bound, bound),
        jax.random.uniform(k3b, (c_out,), jnp.float32, -bound, bound))
    out_nz = jax.jit(lambda xx: cnn_forward(xx, params_nz))(x)
    jax.block_until_ready(out_nz)
    np.testing.assert_allclose(np.asarray(out_nz),
                               np.asarray(_forward_ref(x, params_nz)),
                               rtol=2e-2, atol=2e-2)

    print("KERNEL_OK")
</pallas_src>

<mosaic_0001>
module attributes {stable_mosaic.version = 11 : i64} {
  func.func @kernel(%arg0: i32, %arg1: memref<4x256xf32, #tpu.memory_space<vmem>>, %arg2: memref<128x4xf32, #tpu.memory_space<vmem>>, %arg3: memref<128x1xf32, #tpu.memory_space<vmem>>, %arg4: memref<128x128xbf16, #tpu.memory_space<vmem>>, %arg5: memref<128x1xf32, #tpu.memory_space<vmem>>, %arg6: memref<8x128xbf16, #tpu.memory_space<vmem>>, %arg7: memref<8x1xf32, #tpu.memory_space<vmem>>, %arg8: memref<8x256xf32, #tpu.memory_space<vmem>>) attributes {dimension_semantics = [#tpu.dimension_semantics<parallel>], iteration_bounds = array<i64: 2>, scalar_prefetch = 0 : i64, scratch_operands = 0 : i64, tpu.core_type = #tpu.core_type<tc>, window_params = [{transform_indices = @transform_0, window_bounds = array<i64: 4, 256>}, {pipeline_mode = #tpu.pipeline_mode<synchronous>, transform_indices = @transform_1, window_bounds = array<i64: 128, 4>}, {pipeline_mode = #tpu.pipeline_mode<synchronous>, transform_indices = @transform_2, window_bounds = array<i64: 128, 1>}, {pipeline_mode = #tpu.pipeline_mode<synchronous>, transform_indices = @transform_3, window_bounds = array<i64: 128, 128>}, {pipeline_mode = #tpu.pipeline_mode<synchronous>, transform_indices = @transform_4, window_bounds = array<i64: 128, 1>}, {pipeline_mode = #tpu.pipeline_mode<synchronous>, transform_indices = @transform_5, window_bounds = array<i64: 8, 128>}, {pipeline_mode = #tpu.pipeline_mode<synchronous>, transform_indices = @transform_6, window_bounds = array<i64: 8, 1>}, {transform_indices = @transform_7, window_bounds = array<i64: 8, 256>}]} {
    %c0 = arith.constant 0 : index
    %c0_0 = arith.constant 0 : index
    %0 = vector.load %arg1[%c0, %c0_0] : memref<4x256xf32, #tpu.memory_space<vmem>>, vector<4x256xf32>
    %c0_1 = arith.constant 0 : index
    %c0_2 = arith.constant 0 : index
    %1 = vector.load %arg2[%c0_1, %c0_2] : memref<128x4xf32, #tpu.memory_space<vmem>>, vector<128x4xf32>
    %2 = vector.extract_strided_slice %1 {offsets = [0, 0], sizes = [128, 1], strides = [1, 1]} : vector<128x4xf32> to vector<128x1xf32>
    %3 = vector.extract_strided_slice %0 {offsets = [0, 0], sizes = [1, 256], strides = [1, 1]} : vector<4x256xf32> to vector<1x256xf32>
    %4 = vector.broadcast %2 : vector<128x1xf32> to vector<128x256xf32>
    %5 = vector.broadcast %3 : vector<1x256xf32> to vector<128x256xf32>
    %6 = arith.mulf %4, %5 : vector<128x256xf32>
    %7 = vector.extract_strided_slice %1 {offsets = [0, 1], sizes = [128, 1], strides = [1, 1]} : vector<128x4xf32> to vector<128x1xf32>
    %8 = vector.extract_strided_slice %0 {offsets = [1, 0], sizes = [1, 256], strides = [1, 1]} : vector<4x256xf32> to vector<1x256xf32>
    %9 = vector.broadcast %7 : vector<128x1xf32> to vector<128x256xf32>
    %10 = vector.broadcast %8 : vector<1x256xf32> to vector<128x256xf32>
    %11 = arith.mulf %9, %10 : vector<128x256xf32>
    %12 = arith.addf %6, %11 : vector<128x256xf32>
    %13 = vector.extract_strided_slice %1 {offsets = [0, 2], sizes = [128, 1], strides = [1, 1]} : vector<128x4xf32> to vector<128x1xf32>
    %14 = vector.extract_strided_slice %0 {offsets = [2, 0], sizes = [1, 256], strides = [1, 1]} : vector<4x256xf32> to vector<1x256xf32>
    %15 = vector.broadcast %13 : vector<128x1xf32> to vector<128x256xf32>
    %16 = vector.broadcast %14 : vector<1x256xf32> to vector<128x256xf32>
    %17 = arith.mulf %15, %16 : vector<128x256xf32>
    %18 = arith.addf %12, %17 : vector<128x256xf32>
    %19 = vector.extract_strided_slice %1 {offsets = [0, 3], sizes = [128, 1], strides = [1, 1]} : vector<128x4xf32> to vector<128x1xf32>
    %20 = vector.extract_strided_slice %0 {offsets = [3, 0], sizes = [1, 256], strides = [1, 1]} : vector<4x256xf32> to vector<1x256xf32>
    %21 = vector.broadcast %19 : vector<128x1xf32> to vector<128x256xf32>
    %22 = vector.broadcast %20 : vector<1x256xf32> to vector<128x256xf32>
    %23 = arith.mulf %21, %22 : vector<128x256xf32>
    %24 = arith.addf %18, %23 : vector<128x256xf32>
    %c0_3 = arith.constant 0 : index
    %c0_4 = arith.constant 0 : index
    %25 = vector.load %arg3[%c0_3, %c0_4] : memref<128x1xf32, #tpu.memory_space<vmem>>, vector<128x1xf32>
    %26 = vector.broadcast %25 : vector<128x1xf32> to vector<128x256xf32>
    %27 = arith.addf %24, %26 : vector<128x256xf32>
    %cst = arith.constant 0.000000e+00 : f32
    %28 = vector.broadcast %cst : f32 to vector<128x256xf32>
    %29 = arith.maximumf %27, %28 : vector<128x256xf32>
    %30 = math.absf %27 : vector<128x256xf32>
    %cst_5 = arith.constant 0.000000e+00 : f32
    %31 = vector.broadcast %cst_5 : f32 to vector<128x256xf32>
    %32 = arith.subf %31, %30 : vector<128x256xf32>
    %33 = math.exp %32 : vector<128x256xf32>
    %34 = math.log1p %33 : vector<128x256xf32>
    %35 = arith.addf %29, %34 : vector<128x256xf32>
    %c0_6 = arith.constant 0 : index
    %c0_7 = arith.constant 0 : index
    %36 = vector.load %arg4[%c0_6, %c0_7] : memref<128x128xbf16, #tpu.memory_space<vmem>>, vector<128x128xbf16>
    %37 = arith.truncf %35 : vector<128x256xf32> to vector<128x256xbf16>
    %cst_8 = arith.constant dense<0.000000e+00> : vector<128x256xf32>
    %38 = tpu.matmul %36, %37, %cst_8 {dimension_numbers = #tpu.dot_dimension_numbers<[1], [0], [0], [1], [0, 0, 1, 1], [], []>} : vector<128x128xbf16>, vector<128x256xbf16>, vector<128x256xf32> -> vector<128x256xf32>
    %c0_9 = arith.constant 0 : index
    %c0_10 = arith.constant 0 : index
    %39 = vector.load %arg5[%c0_9, %c0_10] : memref<128x1xf32, #tpu.memory_space<vmem>>, vector<128x1xf32>
    %40 = vector.broadcast %39 : vector<128x1xf32> to vector<128x256xf32>
    %41 = arith.addf %38, %40 : vector<128x256xf32>
    %cst_11 = arith.constant 0.000000e+00 : f32
    %42 = vector.broadcast %cst_11 : f32 to vector<128x256xf32>
    %43 = arith.maximumf %41, %42 : vector<128x256xf32>
    %44 = math.absf %41 : vector<128x256xf32>
    %cst_12 = arith.constant 0.000000e+00 : f32
    %45 = vector.broadcast %cst_12 : f32 to vector<128x256xf32>
    %46 = arith.subf %45, %44 : vector<128x256xf32>
    %47 = math.exp %46 : vector<128x256xf32>
    %48 = math.log1p %47 : vector<128x256xf32>
    %49 = arith.addf %43, %48 : vector<128x256xf32>
    %c0_13 = arith.constant 0 : index
    %c0_14 = arith.constant 0 : index
    %50 = vector.load %arg6[%c0_13, %c0_14] : memref<8x128xbf16, #tpu.memory_space<vmem>>, vector<8x128xbf16>
    %51 = arith.truncf %49 : vector<128x256xf32> to vector<128x256xbf16>
    %cst_15 = arith.constant dense<0.000000e+00> : vector<8x256xf32>
    %52 = tpu.matmul %50, %51, %cst_15 {dimension_numbers = #tpu.dot_dimension_numbers<[1], [0], [0], [1], [0, 0, 1, 1], [], []>} : vector<8x128xbf16>, vector<128x256xbf16>, vector<8x256xf32> -> vector<8x256xf32>
    %c0_16 = arith.constant 0 : index
    %c0_17 = arith.constant 0 : index
    %53 = vector.load %arg7[%c0_16, %c0_17] : memref<8x1xf32, #tpu.memory_space<vmem>>, vector<8x1xf32>
    %54 = vector.broadcast %53 : vector<8x1xf32> to vector<8x256xf32>
    %55 = arith.addf %52, %54 : vector<8x256xf32>
    %c0_18 = arith.constant 0 : index
    %c0_19 = arith.constant 0 : index
    %56 = vector.load %arg8[%c0_18, %c0_19] : memref<8x256xf32, #tpu.memory_space<vmem>>, vector<8x256xf32>
    tpu.vector_store %arg8[%c0_18, %c0_19], %55 {strides = array<i32>} : memref<8x256xf32, #tpu.memory_space<vmem>>, vector<8x256xf32>,
    return
  }
  func.func @transform_0(%arg0: i32) -> (i32, i32) {
    %c0_i32 = arith.constant 0 : i32
    %c0_i32_0 = arith.constant 0 : i32
    return %c0_i32, %arg0 : i32, i32
  }
  func.func @transform_1(%arg0: i32) -> (i32, i32) {
    %c0_i32 = arith.constant 0 : i32
    %c0_i32_0 = arith.constant 0 : i32
    %c0_i32_1 = arith.constant 0 : i32
    return %c0_i32, %c0_i32_0 : i32, i32
  }
  func.func @transform_2(%arg0: i32) -> (i32, i32) {
    %c0_i32 = arith.constant 0 : i32
    %c0_i32_0 = arith.constant 0 : i32
    %c0_i32_1 = arith.constant 0 : i32
    return %c0_i32, %c0_i32_0 : i32, i32
  }
  func.func @transform_3(%arg0: i32) -> (i32, i32) {
    %c0_i32 = arith.constant 0 : i32
    %c0_i32_0 = arith.constant 0 : i32
    %c0_i32_1 = arith.constant 0 : i32
    return %c0_i32, %c0_i32_0 : i32, i32
  }
  func.func @transform_4(%arg0: i32) -> (i32, i32) {
    %c0_i32 = arith.constant 0 : i32
    %c0_i32_0 = arith.constant 0 : i32
    %c0_i32_1 = arith.constant 0 : i32
    return %c0_i32, %c0_i32_0 : i32, i32
  }
  func.func @transform_5(%arg0: i32) -> (i32, i32) {
    %c0_i32 = arith.constant 0 : i32
    %c0_i32_0 = arith.constant 0 : i32
    %c0_i32_1 = arith.constant 0 : i32
    return %c0_i32, %c0_i32_0 : i32, i32
  }
  func.func @transform_6(%arg0: i32) -> (i32, i32) {
    %c0_i32 = arith.constant 0 : i32
    %c0_i32_0 = arith.constant 0 : i32
    %c0_i32_1 = arith.constant 0 : i32
    return %c0_i32, %c0_i32_0 : i32, i32
  }
  func.func @transform_7(%arg0: i32) -> (i32, i32) {
    %c0_i32 = arith.constant 0 : i32
    %c0_i32_0 = arith.constant 0 : i32
    return %c0_i32, %arg0 : i32, i32
  }
}

</mosaic_0001>

<bundles_post_ra>
// kernel: _lambda_.1
= control target key start
LH: loop header
LB: loop body
LE: loop exit
PB: predicated region body
PF: predicated region fallthrough
CT: control target
= control target key end

     0   :  { %s2757_s24 = smov 0   ;;  %s4496_s0 = inlined_call_operand.vmem [shape: f32[4,512], index: 0, kind: input, shape index: {}]   ;;  %s4497_s1 = inlined_call_operand.vmem [shape: f32[128,4], index: 1, kind: input, shape index: {}]   ;;  %s4498_s2 = inlined_call_operand.vmem [shape: f32[128,1], index: 2, kind: input, shape index: {}]   ;;  %s4499_s3 = inlined_call_operand.vmem [shape: bf16[128,128], index: 3, kind: input, shape index: {}]   ;;  %s4500_s4 = inlined_call_operand.vmem [shape: f32[128,1], index: 4, kind: input, shape index: {}]   ;;  %s4501_s5 = inlined_call_operand.vmem [shape: bf16[8,128], index: 5, kind: input, shape index: {}]   ;;  %s4502_s6 = inlined_call_operand.vmem [shape: f32[8,1], index: 6, kind: input, shape index: {}]   ;;  %s4503_s7 = inlined_call_operand.vmem [shape: f32[8,512], index: 7, kind: output, shape index: {}]  }
   0x1 LB: > { %s2368_s25 = sadd.s32 4294967295, %s2711_s24   ;;  %p2372_p0 = scmp.ge.s32.totalorder %s2711_s24, 1  ;;  %s2711_s24 = sphi %s2757_s24, %s17_s24  }
   0x2   : > { %p238_p1 = scmp.lt.s32.totalorder %s2711_s24, 3 }
   0x4   : > { %p239_p2 = pnand %p2372_p0, %p238_p1 }
   0x6   : > { %242 = sbr.rel (%p239_p2) target bundleno = 1016 (0x3f8), region = 48 }
   0xd   : > { %v288_v0 = vld [vmem:[%s4497_s1 + $0x20] sm:$0xff]  ;;  %v2713_v2 = vmov 1   ;;  %v285_v4 = vld [vmem:[%s4497_s1 + $0x8] sm:$0xff]  ;;  %v4504_v5 = vmov 0   ;;  %v2715_v7 = vmov 2   ;;  %v286_v8 = vld [vmem:[%s4497_s1 + $0x10] sm:$0xff]  ;;  %v381_v46 = vlaneseq }
   0xe   : > { %v2771_v1 = vld [vmem:[%s4497_s1] sm:$0xff]  ;;  %2406 = vset.pattern.permute.xlu0 %v2713_v2  ;;  %2399 = vset.pattern.permute.xlu1 %v2713_v2  ;;  %v287_v9 = vld [vmem:[%s4497_s1 + $0x18] sm:$0xff]  ;;  %v2716_v10 = vmov 3   ;;  %v289_v11 = vld [vmem:[%s4497_s1 + $0x28] sm:$0xff]  ;;  %s2373_s23 = sshll.u32 %s2368_s25, 1 }
   0xf   : > { %448 = vperm.xlu0 %2406, %v288_v0   ;;  %432 = vperm.xlu1 %2399, %v2771_v1   ;;  %v2779_v3 = vld [vmem:[%s4497_s1 + $0x40] sm:$0xff]  ;;  %v291_v12 = vld [vmem:[%s4497_s1 + $0x38] sm:$0xff]  ;;  %v870_v15 = vld [vmem:[%s4498_s2 + $0x8] sm:$0xff]  ;;  %p271_p3 = scmp.lt.s32.totalorder %s2373_s23, 3  ;;  %v382_v50 = vshrl.u32 %v381_v46, 7 }
  0x10   : > { %1685 = vmatprep.mubr.bf16.mxu0 %v4504_v5  ;;  %2301 = vmatprep.mubr.bf16.mxu1 %v4504_v5  ;;  %v2790_v6 = vld [vmem:[%s4497_s1 + $0x60] sm:$0xff]  ;;  %v2823_v13 = vld [vmem:[%s4497_s1 + $0x58] sm:$0xff]  ;;  %v2837_v16 = vld [vmem:[%s4497_s1 + $0x70] sm:$0xff] }
  0x11   : > { %v869_v14 = vld [vmem:[%s4498_s2] sm:$0xff]  ;;  %v290_v17 = vld [vmem:[%s4497_s1 + $0x30] sm:$0xff]  ;;  %v872_v18 = vld [vmem:[%s4498_s2 + $0x18] sm:$0xff]  ;;  %s4660_s23 = smov (!%p271_p3, %s2373_s23), 3  ;;  %v497_v53 = vsub.s32 1, %v382_v50  ;;  %v501_v54 = vsub.s32 5, %v382_v50 }
  0x12   : > { %v871_v19 = vld [vmem:[%s4498_s2 + $0x10] sm:$0xff]  ;;  %v876_v20 = vld [vmem:[%s4498_s2 + $0x38] sm:$0xff]  ;;  %v293_v22 = vld [vmem:[%s4497_s1 + $0x48] sm:$0xff]  ;;  %s2374_s25 = sshll.u32 %s4660_s23, 2  ;;  %v383_v56 = vsub.s32 0, %v382_v50  ;;  %v387_v57 = vsub.s32 4, %v382_v50 }
  0x13   : > { %464 = vperm.xlu0 %2406, %v2779_v3   ;;  %436 = vperm.xlu1 %2399, %v285_v4   ;;  %v2866_v21 = vld [vmem:[%s4497_s1 + $0x78] sm:$0xff]  ;;  %v882_v24 = vld [vmem:[%s4498_s2 + $0x68] sm:$0xff]  ;;  %v1509_v25 = vld [vmem:[%s4500_s4] sm:$0xff]  ;;  %s274_s11 = scalar_lea.vmem %s4496_s0, %s2374_s25  ;;  %v643_v60 = vsub.s32 2, %v382_v50  ;;  %v647_v61 = vsub.s32 6, %v382_v50  ;;  %s2376_s18 = sshll.u32 %s4660_s23, 3 }
  0x14   : > { %v880_v23 = vld [vmem:[%s4498_s2 + $0x58] sm:$0xff]  ;;  %v873_v26 = vld [vmem:[%s4498_s2 + $0x20] sm:$0xff]  ;;  %v1511_v27 = vld [vmem:[%s4500_s4 + $0x10] sm:$0xff]  ;;  %s280_s21 = scalar_lea.vmem %s4503_s7, %s2376_s18 }
  0x15   : > { %v874_v28 = vld [vmem:[%s4498_s2 + $0x28] sm:$0xff]  ;;  %v1513_v29 = vld [vmem:[%s4500_s4 + $0x20] sm:$0xff]  ;;  %v1515_v30 = vld [vmem:[%s4500_s4 + $0x30] sm:$0xff] }
  0x16   : > { %v1517_v33 = vld [vmem:[%s4500_s4 + $0x40] sm:$0xff]  ;;  %v2911_v34 = vld [vmem:[%s4497_s1 + $0x50] sm:$0xff] }
  0x17   : > { %480 = vperm.xlu0 %2406, %v2790_v6   ;;  %2400 = vset.pattern.permute.xlu1 %v2715_v7  ;;  %v1519_v37 = vld [vmem:[%s4500_s4 + $0x50] sm:$0xff]  ;;  %v1521_v40 = vld [vmem:[%s4500_s4 + $0x60] sm:$0xff] }
  0x18   : > { %582 = vperm.xlu1 %2400, %v285_v4   ;;  %v1523_v42 = vld [vmem:[%s4500_s4 + $0x70] sm:$0xff]  ;;  %v2263_v45 = vld [vmem:[%s4502_s6] sm:$0xff] }
  0x19   : > { %v875_v49 = vld [vmem:[%s4498_s2 + $0x30] sm:$0xff]  ;;  %v283_v55 = vld [vmem:[%s274_s11] sm:$0xff] }
  0x1a   : > { %v498_v62 = vrot.slane %v283_v55, %v497_v53  ;;  %v502_v63 = vrot.slane %v283_v55, %v501_v54 }
  0x1b   : > { %2427 = vset.pattern.permute.xlu0 %v2715_v7 }
  0x1c   : > { %578 = vperm.xlu0 %2427, %v2771_v1   ;;  %2401 = vset.pattern.permute.xlu1 %v4504_v5 }
  0x1d   : > { %312 = vperm.xlu1 %2401, %v286_v8  }
  0x20   : > { %590 = vperm.xlu0 %2427, %v287_v9  }
  0x21   : > { %2402 = vset.pattern.permute.xlu1 %v2713_v2 }
  0x22   : > { %440 = vperm.xlu1 %2402, %v286_v8  }
  0x24   : > { %594 = vperm.xlu0 %2427, %v288_v0  }
  0x26   : > { %444 = vperm.xlu1 %2402, %v287_v9  }
  0x28   : > { %610 = vperm.xlu0 %2427, %v2779_v3  }
  0x2a   : > { %2403 = vset.pattern.permute.xlu1 %v2716_v10 }
  0x2b   : > { %728 = vperm.xlu1 %2403, %v285_v4  }
  0x2c   : > { %626 = vperm.xlu0 %2427, %v2790_v6  }
  0x2f   : > { %2404 = vset.pattern.permute.xlu1 %v2715_v7 }
  0x30   : > { %2431 = vset.pattern.permute.xlu0 %v2716_v10  ;;  %586 = vperm.xlu1 %2404, %v286_v8  }
  0x31   : > { %724 = vperm.xlu0 %2431, %v2771_v1  }
  0x34   : > { %2405 = vset.pattern.permute.xlu1 %v4504_v5 }
  0x35   : > { %736 = vperm.xlu0 %2431, %v287_v9   ;;  %322 = vperm.xlu1 %2405, %v288_v0  }
  0x39   : > { %740 = vperm.xlu0 %2431, %v288_v0   ;;  %327 = vperm.xlu1 %2405, %v289_v11   ;;  %v384_v0 = vrot.slane %v283_v55, %v383_v56 }
  0x3d   : > { %752 = vperm.xlu0 %2431, %v291_v12   ;;  %2407 = vset.pattern.permute.xlu1 %v2713_v2 }
  0x3e   : > { %452 = vperm.xlu1 %2407, %v289_v11  }
  0x41   : > { %756 = vperm.xlu0 %2431, %v2779_v3  }
  0x42   : > { %2408 = vset.pattern.permute.xlu1 %v2716_v10 }
  0x43   : > { %732 = vperm.xlu1 %2408, %v286_v8   ;;  %v644_v8 = vrot.slane %v283_v55, %v643_v60 }
  0x45   : > { %768 = vperm.xlu0 %2431, %v2823_v13  }
  0x47   : > { %2409 = vset.pattern.permute.xlu1 %v4504_v5 }
  0x48   : > { %887 = vperm.xlu1 %2409, %v869_v14   ;;  %v2976_v14 = vrot.slane %v502_v63, %v497_v53  ;;  %v878_v63 = vld [vmem:[%s4498_s2 + $0x48] sm:$0xff] }
  0x49   : > { %772 = vperm.xlu0 %2431, %v2790_v6  }
  0x4c   : > { %892 = vperm.xlu1 %2409, %v870_v15   ;;  %v2978_v15 = vrot.slane %v384_v0, %v383_v56 }
  0x4d   : > { %780 = vperm.xlu0 %2431, %v2837_v16  }
  0x50   : > { %2410 = vset.pattern.permute.xlu1 %v2715_v7 }
  0x51   : > { %2438 = vset.pattern.permute.xlu0 %v4504_v5  ;;  %598 = vperm.xlu1 %2410, %v289_v11  }
  0x52   : > { %302 = vperm.xlu0 %2438, %v2771_v1   ;;  %v388_v1 = vrot.slane %v283_v55, %v387_v57 }
  0x55   : > { %2411 = vset.pattern.permute.xlu1 %v4504_v5 }
  0x56   : > { %307 = vperm.xlu0 %2438, %v285_v4   ;;  %332 = vperm.xlu1 %2411, %v290_v17   ;;  %v793_v4 = vsub.s32 7, %v382_v50 }
  0x5a   : > { %317 = vperm.xlu0 %2438, %v287_v9   ;;  %2412 = vset.pattern.permute.xlu1 %v2713_v2  ;;  %v648_v9 = vrot.slane %v283_v55, %v647_v61 }
  0x5b   : > { %456 = vperm.xlu1 %2412, %v290_v17  }
  0x5e   : > { %337 = vperm.xlu0 %2438, %v291_v12  }
  0x5f   : > { %460 = vperm.xlu1 %2412, %v291_v12  }
  0x62   : > { %902 = vperm.xlu0 %2438, %v872_v18   ;;  %v2985_v18 = vld [vmem:[%s4497_s1 + $0x68] sm:$0xff] }
  0x63   : > { %2413 = vset.pattern.permute.xlu1 %v2716_v10 }
  0x64   : > { %744 = vperm.xlu1 %2413, %v289_v11  }
  0x66   : > { %342 = vperm.xlu0 %2438, %v2779_v3   ;;  %v789_v3 = vsub.s32 3, %v382_v50 }
  0x68   : > { %2414 = vset.pattern.permute.xlu1 %v4504_v5 }
  0x69   : > { %897 = vperm.xlu1 %2414, %v871_v19  }
  0x6a   : > { %357 = vperm.xlu0 %2438, %v2823_v13  }
  0x6d   : > { %2415 = vset.pattern.permute.xlu1 %v2715_v7 }
  0x6e   : > { %602 = vperm.xlu1 %2415, %v290_v17   ;;  %922 = vperm.xlu0 %2438, %v876_v20  }
  0x72   : > { %606 = vperm.xlu1 %2415, %v291_v12   ;;  %362 = vperm.xlu0 %2438, %v2790_v6   ;;  %v2974_v12 = vrot.slane %v498_v62, %v497_v53 }
  0x76   : > { %2416 = vset.pattern.permute.xlu1 %v4504_v5  ;;  %377 = vperm.xlu0 %2438, %v2866_v21  }
  0x77   : > { %347 = vperm.xlu1 %2416, %v293_v22  }
  0x7a   : > { %942 = vperm.xlu0 %2438, %v880_v23   ;;  %v2991_v23 = vrot.slane %v644_v8, %v643_v60 }
  0x7b   : > { %2417 = vset.pattern.permute.xlu1 %v2713_v2 }
  0x7c   : > { %468 = vperm.xlu1 %2417, %v293_v22  }
  0x7e   : > { %952 = vperm.xlu0 %2438, %v882_v24   ;;  %v2993_v24 = vrot.slane %v648_v9, %v643_v60  ;;  %v877_v60 = vld [vmem:[%s4498_s2 + $0x40] sm:$0xff] }
  0x80   : > { %2418 = vset.pattern.permute.xlu1 %v2716_v10 }
  0x81   : > { %748 = vperm.xlu1 %2418, %v290_v17   ;;  %v2980_v17 = vrot.slane %v388_v1, %v383_v56 }
  0x82   : > { %1527 = vperm.xlu0 %2438, %v1509_v25  }
  0x85   : > { %2419 = vset.pattern.permute.xlu1 %v4504_v5 }
  0x86   : > { %907 = vperm.xlu1 %2419, %v873_v26   ;;  %1537 = vperm.xlu0 %2438, %v1511_v27  }
  0x8a   : > { %912 = vperm.xlu1 %2419, %v874_v28   ;;  %1547 = vperm.xlu0 %2438, %v1513_v29  }
  0x8e   : > { %2420 = vset.pattern.permute.xlu1 %v2715_v7  ;;  %v2901_v31 = vpop.permute.xlu1 %432  ;;  %v2903_v32 = vpop.permute.xlu0 %448  ;;  %1557 = vperm.xlu0 %2438, %v1515_v30  }
  0x8f   : > { %614 = vperm.xlu1 %2420, %v293_v22   ;;  %v521_v19 = vmul.f32 %v2974_v12, %v2903_v32  ;;  %v522_v20 = vmul.f32 %v2976_v14, %v2903_v32  ;;  %v514_v9 = vmul.f32 %v2976_v14, %v2901_v31 }
  0x92   : > { %v2913_v35 = vpop.permute.xlu1 %436  ;;  %v2915_v36 = vpop.permute.xlu0 %464  ;;  %1567 = vperm.xlu0 %2438, %v1517_v33  }
  0x93   : > { %2421 = vset.pattern.permute.xlu1 %v4504_v5 }
  0x94   : > { %352 = vperm.xlu1 %2421, %v2911_v34  }
  0x96   : > { %v2922_v38 = vpop.permute.xlu0 %480  ;;  %1577 = vperm.xlu0 %2438, %v1519_v37  }
  0x97   : > { %v2924_v39 = vpop.permute.xlu1 %582 }
  0x98   : > { %2422 = vset.pattern.permute.xlu1 %v2713_v2 }
  0x99   : > { %472 = vperm.xlu1 %2422, %v2911_v34  }
  0x9a   : > { %1587 = vperm.xlu0 %2438, %v1521_v40  }
  0x9b   : > { %v2933_v41 = vpop.permute.xlu0 %578 }
  0x9c   : > { %v2938_v43 = vpop.permute.xlu1 %312 }
  0x9d   : > { %476 = vperm.xlu1 %2422, %v2823_v13  }
  0x9e   : > { %1597 = vperm.xlu0 %2438, %v1523_v42  }
  0x9f   : > { %v2941_v44 = vpop.permute.xlu0 %590 }
  0xa1   : > { %2423 = vset.pattern.permute.xlu1 %v2716_v10  ;;  %v2949_v47 = vpop.permute.xlu1 %440 }
  0xa2   : > { %760 = vperm.xlu1 %2423, %v293_v22   ;;  %2266 = vperm.xlu0 %2438, %v2263_v45   ;;  %v794_v22 = vrot.slane %v283_v55, %v793_v4 }
  0xa3   : > { %v595_v48 = vpop.permute.xlu0 %594 }
  0xa4   : > { %v667_v29 = vmul.f32 %v2991_v23, %v595_v48  ;;  %v668_v30 = vmul.f32 %v2993_v24, %v595_v48  ;;  %v3005_v33 = vrot.slane %v794_v22, %v789_v3 }
  0xa5   : > { %v2955_v51 = vpop.permute.xlu1 %444 }
  0xa6   : > { %2424 = vset.pattern.permute.xlu1 %v4504_v5 }
  0xa7   : > { %917 = vperm.xlu1 %2424, %v875_v49   ;;  %v2961_v52 = vpop.permute.xlu0 %610 }
  0xaa   : > { %v2963_v58 = vpop.permute.xlu1 %728 }
  0xab   : > { %2425 = vset.pattern.permute.xlu1 %v2715_v7  ;;  %v2966_v59 = vpop.permute.xlu0 %626 }
  0xac   : > { %618 = vperm.xlu1 %2425, %v2911_v34  }
  0xaf   : > { %v2969_v6 = vpop.permute.xlu1 %586 }
  0xb0   : > { %v2971_v11 = vpop.permute.xlu0 %724  ;;  %622 = vperm.xlu1 %2425, %v2823_v13   ;;  %v790_v13 = vrot.slane %v283_v55, %v789_v3 }
  0xb1   : > { %v806_v22 = vmul.f32 %v3005_v33, %v2971_v11 }
  0xb2   : > { %v3003_v32 = vrot.slane %v790_v13, %v789_v3 }
  0xb4   : > { %v2995_v25 = vpop.permute.xlu0 %736  ;;  %2426 = vset.pattern.permute.xlu1 %v4504_v5  ;;  %v323_v26 = vpop.permute.xlu1 %322 }
  0xb5   : > { %v407_v27 = vmul.f32 %v2978_v15, %v323_v26  ;;  %v408_v28 = vmul.f32 %v2980_v17, %v323_v26  ;;  %367 = vperm.xlu1 %2426, %v2985_v18  }
  0xb7   : > { %v553_v37 = vadd.f32 %v521_v19, %v407_v27  ;;  %v554_v40 = vadd.f32 %v522_v20, %v408_v28  ;;  %v660_v19 = vmul.f32 %v2993_v24, %v2933_v41  ;;  %v513_v27 = vmul.f32 %v2974_v12, %v2901_v31 }
  0xb8   : > { %v741_v42 = vpop.permute.xlu0 %740  ;;  %v3007_v45 = vpop.permute.xlu1 %327  ;;  %v662_v31 = vmul.f32 %v2993_v24, %v2924_v39 }
  0xb9   : > { %v813_v46 = vmul.f32 %v3003_v32, %v741_v42  ;;  %v814_v49 = vmul.f32 %v3005_v33, %v741_v42  ;;  %2428 = vset.pattern.permute.xlu1 %v2713_v2  ;;  %v699_v50 = vadd.f32 %v667_v29, %v553_v37  ;;  %v700_v53 = vadd.f32 %v668_v30, %v554_v40 }
  0xba   : > { %484 = vperm.xlu1 %2428, %v2985_v18   ;;  %v516_v30 = vmul.f32 %v2976_v14, %v2913_v35  ;;  %v515_v42 = vmul.f32 %v2974_v12, %v2913_v35  ;;  %v519_v35 = vmul.f32 %v2974_v12, %v2955_v51 }
  0xbb   : > { %v3015_v54 = vadd.f32 %v813_v46, %v699_v50  ;;  %v3017_v55 = vadd.f32 %v814_v49, %v700_v53  ;;  %v659_v46 = vmul.f32 %v2991_v23, %v2933_v41  ;;  %v665_v50 = vmul.f32 %v2991_v23, %v2941_v44 }
  0xbc   : > { %v3013_v48 = vpop.permute.xlu0 %752  ;;  %v520_v41 = vmul.f32 %v2976_v14, %v2955_v51 }
  0xbd   : > { %v3019_v56 = vpop.permute.xlu1 %452 }
  0xbe   : > { %2429 = vset.pattern.permute.xlu1 %v2716_v10 }
  0xbf   : > { %764 = vperm.xlu1 %2429, %v2911_v34  }
  0xc0   : > { %v3023_v57 = vpop.permute.xlu0 %756 }
  0xc2   : > { %v3028_v61 = vpop.permute.xlu1 %732 }
  0xc3   : > { %2430 = vset.pattern.permute.xlu1 %v4504_v5 }
  0xc4   : > { %927 = vperm.xlu1 %2430, %v877_v60   ;;  %v3031_v62 = vpop.permute.xlu0 %768 }
  0xc7   : > { %v3036_v0 = vpop.permute.xlu1 %887 }
  0xc8   : > { %932 = vperm.xlu1 %2430, %v878_v63   ;;  %v3038_v34 = vpop.permute.xlu0 %772  ;;  %v808_v63 = vmul.f32 %v3005_v33, %v2963_v58 }
  0xcb   : > { %v3040_v1 = vpop.permute.xlu1 %892 }
  0xcc   : > { %2432 = vset.pattern.permute.xlu1 %v2715_v7  ;;  %v3043_v3 = vpop.permute.xlu0 %780 }
  0xcd   : > { %4511 = vst [vmem:[#allocation2_spill] sm:$0xff] %v3043_v3  ;;  %630 = vperm.xlu1 %2432, %v2985_v18  }
  0xd0   : > { %v3046_v4 = vpop.permute.xlu1 %598 }
  0xd1   : > { %v303_v8 = vpop.permute.xlu0 %302  ;;  %2433 = vset.pattern.permute.xlu1 %v4504_v5 }
  0xd2   : > { %v400_v20 = vmul.f32 %v2980_v17, %v303_v8  ;;  %372 = vperm.xlu1 %2433, %v2837_v16   ;;  %v399_v13 = vmul.f32 %v2978_v15, %v303_v8 }
  0xd4   : > { %v546_v26 = vadd.f32 %v514_v9, %v400_v20  ;;  %v545_v49 = vadd.f32 %v513_v27, %v399_v13 }
  0xd5   : > { %v308_v28 = vpop.permute.xlu0 %307  ;;  %v3060_v29 = vpop.permute.xlu1 %332 }
  0xd6   : > { %v692_v37 = vadd.f32 %v660_v19, %v546_v26  ;;  %v402_v40 = vmul.f32 %v2980_v17, %v308_v28  ;;  %2434 = vset.pattern.permute.xlu1 %v2713_v2  ;;  %v666_v2 = vmul.f32 %v2993_v24, %v2941_v44  ;;  %v401_v9 = vmul.f32 %v2978_v15, %v308_v28 }
  0xd7   : > { %488 = vperm.xlu1 %2434, %v2837_v16   ;;  %v805_v44 = vmul.f32 %v3003_v32, %v2971_v11  ;;  %v811_v26 = vmul.f32 %v3003_v32, %v2995_v25  ;;  %v691_v51 = vadd.f32 %v659_v46, %v545_v49  ;;  %v812_v28 = vmul.f32 %v3005_v33, %v2995_v25 }
  0xd8   : > { %v838_v53 = vadd.f32 %v806_v22, %v692_v37  ;;  %v548_v60 = vadd.f32 %v516_v30, %v402_v40  ;;  %v517_v11 = vmul.f32 %v2974_v12, %v2949_v47  ;;  %v518_v46 = vmul.f32 %v2976_v14, %v2949_v47 }
  0xd9   : > { %v318_v8 = vpop.permute.xlu0 %317  ;;  %v547_v25 = vadd.f32 %v515_v42, %v401_v9  ;;  %v663_v42 = vmul.f32 %v2991_v23, %v2969_v6 }
  0xda   : > { %v694_v19 = vadd.f32 %v662_v31, %v548_v60  ;;  %v405_v20 = vmul.f32 %v2978_v15, %v318_v8  ;;  %v406_v13 = vmul.f32 %v2980_v17, %v318_v8  ;;  %v3086_v22 = vpop.permute.xlu1 %456  ;;  %v3094_v27 = vadd.f32 %v3036_v0, %v838_v53 }
  0xdb   : > { %492 = vperm.xlu1 %2434, %v2866_v21   ;;  %v529_v31 = vmul.f32 %v2974_v12, %v2915_v36  ;;  %v403_v60 = vmul.f32 %v2978_v15, %v2938_v43  ;;  %v404_v8 = vmul.f32 %v2980_v17, %v2938_v43  ;;  %v664_v43 = vmul.f32 %v2993_v24, %v2969_v6 }
  0xdc   : > { %v840_v30 = vadd.f32 %v808_v63, %v694_v19  ;;  %v551_v37 = vadd.f32 %v519_v35, %v405_v20  ;;  %v552_v40 = vadd.f32 %v520_v41, %v406_v13  ;;  %v1030_v53 = vand.u32 2147483647, %v3094_v27 }
  0xdd   : > { %v3104_v49 = vpop.permute.xlu0 %337  ;;  %v837_v19 = vadd.f32 %v805_v44, %v691_v51  ;;  %v661_v13 = vmul.f32 %v2991_v23, %v2924_v39  ;;  %v549_v9 = vadd.f32 %v517_v11, %v403_v60  ;;  %v530_v60 = vmul.f32 %v2976_v14, %v2915_v36 }
  0xde   : > { %v3109_v63 = vpop.permute.xlu1 %460  ;;  %v697_v35 = vadd.f32 %v665_v50, %v551_v37  ;;  %v698_v41 = vadd.f32 %v666_v2, %v552_v40  ;;  %v3115_v47 = vadd.f32 %v3040_v1, %v840_v30  ;;  %v1062_v20 = vsub.f32 0.0, %v1030_v53 }
  0xdf   : > { %2435 = vset.pattern.permute.xlu1 %v2716_v10  ;;  %v550_v37 = vadd.f32 %v518_v46, %v404_v8  ;;  %v809_v30 = vmul.f32 %v3003_v32, %v3028_v61  ;;  %v693_v40 = vadd.f32 %v661_v13, %v547_v25  ;;  %v3139_v53 = vadd.f32 %v3036_v0, %v837_v19 }
  0xe0   : > { %776 = vperm.xlu1 %2435, %v2985_v18   ;;  %v843_v50 = vadd.f32 %v811_v26, %v697_v35  ;;  %v844_v2 = vadd.f32 %v812_v28, %v698_v41  ;;  %v1032_v51 = vand.u32 2147483647, %v3115_v47  ;;  %v879_v18 = vld [vmem:[%s4498_s2 + $0x50] sm:$0xff]  ;;  %v1095_v26 = vmul.f32 1.442695, %v1062_v20 }
  0xe1   : > { %v903_v44 = vpop.permute.xlu0 %902  ;;  %v810_v28 = vmul.f32 %v3005_v33, %v3028_v61  ;;  %v807_v25 = vmul.f32 %v3003_v32, %v2963_v58  ;;  %v695_v35 = vadd.f32 %v663_v42, %v549_v9  ;;  %v675_v61 = vmul.f32 %v2991_v23, %v2961_v52 }
  0xe2   : > { %v3127_v39 = vadd.f32 %v903_v44, %v844_v2  ;;  %v3134_v11 = vadd.f32 %v903_v44, %v843_v50  ;;  %v1064_v46 = vsub.f32 0.0, %v1032_v51  ;;  %v696_v8 = vadd.f32 %v664_v43, %v550_v37 }
  0xe3   : > { %v3136_v6 = vpop.permute.xlu1 %744  ;;  %2449 = vpow2.f32 %v1095_v26  ;;  %v839_v19 = vadd.f32 %v807_v25, %v693_v40  ;;  %v841_v13 = vadd.f32 %v809_v30, %v695_v35  ;;  %v1029_v2 = vand.u32 2147483647, %v3139_v53 }
  0xe4   : > { %v1036_v41 = vand.u32 2147483647, %v3127_v39  ;;  %2436 = vset.pattern.permute.xlu1 %v4504_v5  ;;  %v1099_v0 = vmul.f32 1.442695, %v1064_v46  ;;  %v1035_v58 = vand.u32 2147483647, %v3134_v11  ;;  %v842_v42 = vadd.f32 %v810_v28, %v696_v8 }
  0xe5   : > { %937 = vperm.xlu1 %2436, %v879_v18   ;;  %v343_v20 = vpop.permute.xlu0 %342  ;;  %v676_v9 = vmul.f32 %v2993_v24, %v2961_v52  ;;  %v821_v40 = vmul.f32 %v3003_v32, %v3023_v57  ;;  %v3164_v26 = vadd.f32 %v3040_v1, %v839_v19  ;;  %v822_v52 = vmul.f32 %v3005_v33, %v3023_v57 }
  0xe6   : > { %v415_v36 = vmul.f32 %v2978_v15, %v343_v20  ;;  %v416_v50 = vmul.f32 %v2980_v17, %v343_v20  ;;  %2451 = vpow2.f32 %v1099_v0  ;;  %v1068_v37 = vsub.f32 0.0, %v1036_v41 }
  0xe7   : > { %v1067_v28 = vsub.f32 0.0, %v1035_v58  ;;  %v1061_v46 = vsub.f32 0.0, %v1029_v2 }
  0xe8   : > { %v898_v43 = vpop.permute.xlu1 %897  ;;  %v561_v44 = vadd.f32 %v529_v31, %v415_v36  ;;  %v562_v51 = vadd.f32 %v530_v60, %v416_v50  ;;  %v1107_v60 = vmul.f32 1.442695, %v1068_v37  ;;  %v523_v37 = vmul.f32 %v2974_v12, %v3019_v56 }
  0xe9   : > { %v3155_v18 = vadd.f32 %v898_v43, %v841_v13  ;;  %v3157_v30 = vadd.f32 %v898_v43, %v842_v42  ;;  %2437 = vset.pattern.permute.xlu1 %v2715_v7  ;;  %v1105_v0 = vmul.f32 1.442695, %v1067_v28  ;;  %v524_v43 = vmul.f32 %v2976_v14, %v3019_v56  ;;  %v881_v56 = vld [vmem:[%s4498_s2 + $0x60] sm:$0xff] }
  0xea   : > { %634 = vperm.xlu1 %2437, %v2837_v16   ;;  %v707_v35 = vadd.f32 %v675_v61, %v561_v44  ;;  %v708_v7 = vadd.f32 %v676_v9, %v562_v51  ;;  %v1031_v16 = vand.u32 2147483647, %v3164_v26  ;;  %2453 = vpow2.f32 %v1107_v60 }
  0xeb   : > { %v1033_v31 = vand.u32 2147483647, %v3155_v18  ;;  %v1034_v25 = vand.u32 2147483647, %v3157_v30  ;;  %v1093_v61 = vmul.f32 1.442695, %v1061_v46  ;;  %v409_v44 = vmul.f32 %v2978_v15, %v3007_v45 }
  0xec   : > { %v3174_v1 = vadd.f32 %v821_v40, %v707_v35  ;;  %v3178_v13 = vadd.f32 %v822_v52, %v708_v7  ;;  %v1063_v9 = vsub.f32 0.0, %v1031_v16  ;;  %v410_v51 = vmul.f32 %v2980_v17, %v3007_v45  ;;  %v883_v16 = vld [vmem:[%s4498_s2 + $0x70] sm:$0xff] }
  0xed   : > { %v1065_v41 = vsub.f32 0.0, %v1033_v31  ;;  %v3170_v8 = vpop.permute.xlu1 %602  ;;  %v1066_v20 = vsub.f32 0.0, %v1034_v25  ;;  %v3176_v57 = vpop.eup %2449  ;;  %v670_v40 = vmul.f32 %v2993_v24, %v3046_v4  ;;  %v555_v28 = vadd.f32 %v523_v37, %v409_v44 }
  0xee   : > { %638 = vperm.xlu1 %2437, %v2866_v21   ;;  %4512 = vst [vmem:[#allocation3_spill] sm:$0xff] %v3174_v1  ;;  %4513 = vst [vmem:[#allocation4_spill] sm:$0xff] %v3178_v13  ;;  %v1166_v42 = vadd.f32 1.0, %v3176_v57  ;;  %v556_v31 = vadd.f32 %v524_v43, %v410_v51  ;;  %v413_v45 = vmul.f32 %v2978_v15, %v3104_v49  ;;  %v1000_v51 = vmax.f32 %v3115_v47, 0.0 }
  0xef   : > { %v1101_v19 = vmul.f32 1.442695, %v1065_v41  ;;  %v1103_v36 = vmul.f32 1.442695, %v1066_v20  ;;  %v527_v46 = vmul.f32 %v2974_v12, %v3109_v63  ;;  %v414_v60 = vmul.f32 %v2980_v17, %v3104_v49 }
  0xf0   : > { %v3180_v50 = vpop.eup %2451  ;;  %v528_v25 = vmul.f32 %v2976_v14, %v3109_v63  ;;  %v819_v35 = vmul.f32 %v3003_v32, %v3013_v48  ;;  %v3220_v7 = vmul.f32 %v3005_v33, %v3013_v48  ;;  %v702_v20 = vadd.f32 %v670_v40, %v556_v31  ;;  %v884_v31 = vld [vmem:[%s4498_s2 + $0x78] sm:$0xff] }
  0xf1   : > { %2455 = vpow2.f32 %v1101_v19  ;;  %v607_v58 = vpop.permute.xlu1 %606  ;;  %v1184_v2 = vadd.f32 1.0, %v3180_v50  ;;  %v1169_v63 = vmul.f32 -0.5, %v3176_v57  ;;  %v815_v48 = vmul.f32 %v3003_v32, %v3136_v6 }
  0xf2   : > { %2457 = vpow2.f32 %v1103_v36  ;;  %2439 = vset.pattern.permute.xlu1 %v2716_v10  ;;  %v669_v10 = vmul.f32 %v2991_v23, %v3046_v4  ;;  %v3210_v4 = vmul.f32 %v2974_v12, %v2922_v38  ;;  %v560_v43 = vadd.f32 %v528_v25, %v414_v60  ;;  %v3258_v25 = vpop.permute.xlu0 %357 }
  0xf3   : > { %2459 = vpow2.f32 %v1105_v0  ;;  %784 = vperm.xlu1 %2439, %v2866_v21   ;;  %v1097_v21 = vmul.f32 1.442695, %v1063_v9  ;;  %v1187_v9 = vmul.f32 -0.5, %v3180_v50  ;;  %v816_v44 = vmul.f32 %v3005_v33, %v3136_v6 }
  0xf4   : > { %2461 = vpow2.f32 %v1093_v61  ;;  %v701_v41 = vadd.f32 %v669_v10, %v555_v28  ;;  %v3225_v0 = vpop.eup %2453  ;;  %v559_v61 = vadd.f32 %v527_v46, %v413_v45  ;;  %v674_v28 = vmul.f32 %v2993_v24, %v607_v58 }
  0xf5   : > { %2463 = vlog2.f32 %v1166_v42  ;;  %v673_v42 = vmul.f32 %v2991_v23, %v607_v58  ;;  %v1172_v45 = vand.u32 2147483647, %v3176_v57  ;;  %v1188_v10 = vadd.f32 1.0, %v1187_v9 }
  0xf6   : > { %v3201_v52 = vpop.permute.xlu1 %347  ;;  %2465 = vlog2.f32 %v1184_v2  ;;  %v3260_v19 = vadd.f32 %v815_v48, %v701_v41  ;;  %v1190_v46 = vand.u32 2147483647, %v3180_v50  ;;  %v3267_v1 = vadd.f32 %v816_v44, %v702_v20  ;;  %v1510_v41 = vld [vmem:[%s4500_s4 + $0x8] sm:$0xff] }
  0xf7   : > { %2440 = vset.pattern.permute.xlu1 %v4504_v5  ;;  %2467 = vpow2.f32 %v1097_v21  ;;  %v705_v58 = vadd.f32 %v673_v42, %v559_v61  ;;  %vm3273_vm0 = vcmp.lt.f32.partialorder %v1172_v45, 0.0004427343  ;;  %v1223_v48 = vmul.f32 -0.5, %v3225_v0  ;;  %v923_v45 = vpop.permute.xlu0 %922 }
  0xf8   : > { %947 = vperm.xlu1 %2440, %v881_v56   ;;  %v1220_v56 = vadd.f32 1.0, %v3225_v0  ;;  %vm1191_vm1 = vcmp.lt.f32.partialorder %v1190_v46, 0.0004427343 }
  0xf9   : > { %v851_v20 = vadd.f32 %v819_v35, %v705_v58 }
  0xfb   : > { %v3230_v36 = vpop.eup %2455  ;;  %v3235_v2 = vpop.permute.xlu1 %468  ;;  %v3297_v46 = vadd.f32 %v923_v45, %v851_v20 }
  0xfc   : > { %v3238_v37 = vpop.eup %2457  ;;  %957 = vperm.xlu1 %2440, %v883_v16   ;;  %v1193_v60 = vadd.f32 1.0, %v3230_v36  ;;  %v1170_v16 = vadd.f32 1.0, %v1169_v63 }
  0xfd   : > { %v3244_v40 = vpop.eup %2459  ;;  %v1202_v21 = vadd.f32 1.0, %v3238_v37  ;;  %v1205_v35 = vmul.f32 -0.5, %v3238_v37 }
  0xfe   : > { %v3253_v6 = vpop.eup %2461  ;;  %v1211_v3 = vadd.f32 1.0, %v3244_v40  ;;  %v1214_v63 = vmul.f32 -0.5, %v3244_v40  ;;  %v1171_v9 = vmul.f32 %v3176_v57, %v1170_v16  ;;  %v1226_v57 = vand.u32 2147483647, %v3225_v0 }
  0xff   : > { %v2464_v5 = vpop.eup %2463  ;;  %2469 = vlog2.f32 %v1202_v21  ;;  %v706_v21 = vadd.f32 %v674_v28, %v560_v43  ;;  %v1157_v43 = vadd.f32 1.0, %v3253_v6  ;;  %v1217_v28 = vand.u32 2147483647, %v3244_v40 }
 0x100   : > { %v2466_v49 = vpop.eup %2465  ;;  %962 = vperm.xlu1 %2440, %v884_v31   ;;  %v3264_v47 = vpop.permute.xlu1 %748  ;;  %2471 = vlog2.f32 %v1220_v56  ;;  %v1168_v42 = vmul.f32 0.6931472, %v2464_v5  ;;  %v1189_v31 = vmul.f32 %v3180_v50, %v1188_v10  ;;  %v1215_v5 = vadd.f32 1.0, %v1214_v63  ;;  %v1512_v10 = vld [vmem:[%s4500_s4 + $0x18] sm:$0xff] }
 0x101   : > { %2473 = vlog2.f32 %v1193_v60  ;;  %v1186_v44 = vmul.f32 0.6931472, %v2466_v49  ;;  %v3281_v56 = vpop.eup %2467  ;;  %v4516_v63 = vmax.f32 %v3094_v27, 0.0  ;;  %vm3306_vm2 = vcmp.lt.f32.partialorder %v1226_v57, 0.0004427343 }
 0x102   : > { %2475 = vlog2.f32 %v1211_v3  ;;  %v1174_v13 = vsel %vm3273_vm0, %v1171_v9, %v1168_v42  ;;  %v1224_v3 = vadd.f32 1.0, %v1223_v48  ;;  %v1175_v61 = vadd.f32 1.0, %v3281_v56 }
 0x103   : > { %v1192_v50 = vsel %vm1191_vm1, %v1189_v31, %v1186_v44  ;;  %2477 = vlog2.f32 %v1157_v43  ;;  %v1196_v42 = vmul.f32 -0.5, %v3230_v36  ;;  %v852_v9 = vadd.f32 %v3220_v7, %v706_v21  ;;  %v1514_v7 = vld [vmem:[%s4500_s4 + $0x28] sm:$0xff] }
 0x104   : > { %1532 = vperm.xlu1 %2440, %v1510_v41   ;;  %v1448_v58 = vadd.f32 %v1192_v50, %v1000_v51  ;;  %v1446_v41 = vadd.f32 %v1174_v13, %v4516_v63  ;;  %v1199_v27 = vand.u32 2147483647, %v3230_v36  ;;  %v1206_v13 = vadd.f32 1.0, %v1205_v35 }
 0x105   : > { %v908_v49 = vpop.permute.xlu1 %907  ;;  %2479 = vlog2.f32 %v1175_v61  ;;  %v3315_v21 = vmul.f32 %v3244_v40, %v1215_v5  ;;  %v1160_v57 = vmul.f32 -0.5, %v3253_v6  ;;  %v1225_v50 = vmul.f32 %v3225_v0, %v1224_v3  ;;  %v1520_v0 = vld [vmem:[%s4500_s4 + $0x58] sm:$0xff] }
 0x106   : > { %v3292_v60 = vadd.f32 %v908_v49, %v3015_v54  ;;  %v3295_v16 = vadd.f32 %v908_v49, %v3017_v55  ;;  %v1494_v20 = vpack.c.bf16 %v1448_v58, %v1446_v41  ;;  %v1043_v35 = vand.u32 2147483647, %v3297_v46 }
 0x107   : > { %v1178_v58 = vmul.f32 -0.5, %v3281_v56  ;;  %v3322_v61 = vadd.f32 %v923_v45, %v852_v9  ;;  %vm3324_vm3 = vcmp.lt.f32.partialorder %v1217_v28, 0.0004427343  ;;  %vm3328_vm4 = vcmp.lt.f32.partialorder %v1199_v27, 0.0004427343  ;;  %v1516_v45 = vld [vmem:[%s4500_s4 + $0x38] sm:$0xff] }
 0x108   : > { %v1037_v48 = vand.u32 2147483647, %v3292_v60  ;;  %v1038_v54 = vand.u32 2147483647, %v3295_v16  ;;  %1542 = vperm.xlu1 %2440, %v1512_v10   ;;  %v1208_v10 = vand.u32 2147483647, %v3238_v37  ;;  %1653 = vmatprep.subr.bf16.mxu0 %v1494_v20  ;;  %v1207_v3 = vmul.f32 %v3238_v37, %v1206_v13 }
 0x109   : > { %v2470_v55 = vpop.eup %2469  ;;  %v913_v44 = vpop.permute.xlu1 %912  ;;  %v1161_v28 = vadd.f32 1.0, %v1160_v57  ;;  %v1044_v13 = vand.u32 2147483647, %v3322_v61  ;;  %v1179_v57 = vadd.f32 1.0, %v1178_v58 }
 0x10a   : > { %v1069_v31 = vsub.f32 0.0, %v1037_v48  ;;  %v1070_v43 = vsub.f32 0.0, %v1038_v54  ;;  %v2472_v49 = vpop.eup %2471  ;;  %v1204_v41 = vmul.f32 0.6931472, %v2470_v55  ;;  %v1197_v54 = vadd.f32 1.0, %v1196_v42 }
 0x10b   : > { %v2474_v63 = vpop.eup %2473  ;;  %v3334_v20 = vadd.f32 %v913_v44, %v3260_v19  ;;  %v1222_v55 = vmul.f32 0.6931472, %v2472_v49  ;;  %vm3344_vm5 = vcmp.lt.f32.partialorder %v1208_v10, 0.0004427343  ;;  %v1163_v19 = vand.u32 2147483647, %v3253_v6 }
 0x10c   : > { %v1109_v40 = vmul.f32 1.442695, %v1069_v31  ;;  %v1111_v5 = vmul.f32 1.442695, %v1070_v43  ;;  %1552 = vperm.xlu1 %2440, %v1514_v7   ;;  %v2476_v9 = vpop.eup %2475  ;;  %v3340_v7 = vadd.f32 %v913_v44, %v3267_v1  ;;  %v1195_v27 = vmul.f32 0.6931472, %v2474_v63 }
 0x10d   : > { %v1210_v37 = vsel %vm3344_vm5, %v1207_v3, %v1204_v41  ;;  %v1075_v43 = vsub.f32 0.0, %v1043_v35  ;;  %v1518_v1 = vld [vmem:[%s4500_s4 + $0x48] sm:$0xff]  ;;  %v2478_v44 = vpop.eup %2477  ;;  %v1213_v49 = vmul.f32 0.6931472, %v2476_v9  ;;  %v1198_v10 = vmul.f32 %v3230_v36, %v1197_v54 }
 0x10e   : > { %2481 = vpow2.f32 %v1109_v40  ;;  %v3342_v42 = vpop.permute.xlu1 %614  ;;  %v1181_v63 = vand.u32 2147483647, %v3281_v56  ;;  %v1039_v40 = vand.u32 2147483647, %v3334_v20  ;;  %v1228_v41 = vsel %vm3306_vm2, %v1225_v50, %v1222_v55 }
 0x10f   : > { %4523 = vst [vmem:[#allocation5_spill] sm:$0xff] %v3342_v42  ;;  %2483 = vpow2.f32 %v1111_v5  ;;  %v1159_v5 = vmul.f32 0.6931472, %v2478_v44  ;;  %v1162_v35 = vmul.f32 %v3253_v6, %v1161_v28  ;;  %v1040_v58 = vand.u32 2147483647, %v3340_v7  ;;  %v2480_v3 = vpop.eup %2479 }
 0x110   : > { %1562 = vperm.xlu1 %2440, %v1516_v45   ;;  %v1201_v45 = vsel %vm3328_vm4, %v1198_v10, %v1195_v27  ;;  %v4526_v9 = vmax.f32 %v3157_v30, 0.0  ;;  %vm3366_vm6 = vcmp.lt.f32.partialorder %v1163_v19, 0.0004427343  ;;  %v1071_v54 = vsub.f32 0.0, %v1039_v40  ;;  %v363_v19 = vpop.permute.xlu0 %362 }
 0x111   : > { %v1165_v51 = vsel %vm3366_vm6, %v1162_v35, %v1159_v5  ;;  %v1177_v50 = vmul.f32 0.6931472, %v2480_v3  ;;  %v1180_v6 = vmul.f32 %v3281_v56, %v1179_v57  ;;  %v1072_v55 = vsub.f32 0.0, %v1040_v58 }
 0x112   : > { %v1450_v31 = vadd.f32 %v1210_v37, %v4526_v9  ;;  %v1001_v30 = vmax.f32 %v3155_v18, 0.0  ;;  %v1076_v28 = vsub.f32 0.0, %v1044_v13  ;;  %vm1182_vm7 = vcmp.lt.f32.partialorder %v1181_v63, 0.0004427343 }
 0x113   : > { %v353_v42 = vpop.permute.xlu1 %352  ;;  %v1113_v27 = vmul.f32 1.442695, %v1071_v54  ;;  %v1219_v37 = vsel %vm3324_vm3, %v3315_v21, %v1213_v49  ;;  %v4529_v44 = vmax.f32 %v3127_v39, 0.0  ;;  %v1183_v56 = vsel %vm1182_vm7, %v1180_v6, %v1177_v50 }
 0x114   : > { %1572 = vperm.xlu1 %2440, %v1518_v1   ;;  %v1115_v57 = vmul.f32 1.442695, %v1072_v55  ;;  %v1449_v1 = vadd.f32 %v1201_v45, %v1001_v30  ;;  %v4530_v40 = vmax.f32 %v3139_v53, 0.0  ;;  %v4531_v35 = vmax.f32 %v3164_v26, 0.0 }
 0x115   : > { %v1452_v10 = vadd.f32 %v1228_v41, %v4529_v44  ;;  %2485 = vpow2.f32 %v1113_v27  ;;  %v1121_v63 = vmul.f32 1.442695, %v1075_v43  ;;  %v423_v48 = vmul.f32 %v2978_v15, %v363_v19  ;;  %v1522_v43 = vld [vmem:[%s4500_s4 + $0x68] sm:$0xff] }
 0x116   : > { %v1445_v5 = vadd.f32 %v1165_v51, %v4530_v40  ;;  %v1447_v18 = vadd.f32 %v1183_v56, %v4531_v35  ;;  %2487 = vpow2.f32 %v1115_v57  ;;  %v538_v41 = vmul.f32 %v2976_v14, %v2922_v38 }
 0x117   : > { %v1496_v21 = vpack.c.bf16 %v1452_v10, %v1450_v31  ;;  %v4532_v53 = vmax.f32 %v3134_v11, 0.0  ;;  %v424_v3 = vmul.f32 %v2980_v17, %v363_v19  ;;  %v683_v45 = vmul.f32 %v2991_v23, %v2966_v59 }
 0x118   : > { %v3386_v13 = vpop.eup %2481  ;;  %1582 = vperm.xlu1 %2440, %v1520_v0   ;;  %v473_v39 = vpop.permute.xlu1 %472  ;;  %v1493_v26 = vpack.c.bf16 %v1447_v18, %v1445_v5  ;;  %v684_v9 = vmul.f32 %v2993_v24, %v2966_v59  ;;  %v525_v11 = vmul.f32 %v2974_v12, %v3086_v22  ;;  %v419_v51 = vmul.f32 %v2978_v15, %v353_v42 }
 0x119   : > { %v3389_v49 = vpop.eup %2483  ;;  %v1451_v58 = vadd.f32 %v1219_v37, %v4532_v53  ;;  %v1229_v31 = vadd.f32 1.0, %v3386_v13  ;;  %v533_v38 = vmul.f32 %v2974_v12, %v473_v39  ;;  %v526_v50 = vmul.f32 %v2976_v14, %v3086_v22  ;;  %v1524_v37 = vld [vmem:[%s4500_s4 + $0x78] sm:$0xff] }
 0x11a   : > { %v1238_v36 = vadd.f32 1.0, %v3389_v49  ;;  %1654 = vmatpush1.bf16.msra.mxu0 %v1493_v26  ;;  %2489 = vpow2.f32 %v1121_v63  ;;  %v1123_v6 = vmul.f32 1.442695, %v1076_v28  ;;  %v569_v59 = vadd.f32 %v3210_v4, %v423_v48 }
 0x11b   : > { %v1495_v54 = vpack.c.bf16 %v1451_v58, %v1449_v1  ;;  %1655 = vmatprep.subr.bf16.mxu0 %v1496_v21  ;;  %v570_v0 = vadd.f32 %v538_v41, %v424_v3  ;;  %v420_v30 = vmul.f32 %v2980_v17, %v353_v42  ;;  %v534_v27 = vmul.f32 %v2976_v14, %v473_v39 }
 0x11c   : > { %1592 = vperm.xlu1 %2440, %v1522_v43   ;;  %v3412_v55 = vpop.permute.xlu1 %476  ;;  %v3416_v19 = vadd.f32 %v533_v38, %v419_v51  ;;  %v411_v22 = vmul.f32 %v2978_v15, %v3060_v29  ;;  %v412_v4 = vmul.f32 %v2980_v17, %v3060_v29  ;;  %2491 = vlog2.f32 %v1229_v31 }
 0x11d   : > { %v671_v28 = vmul.f32 %v2991_v23, %v3170_v8  ;;  %v672_v42 = vmul.f32 %v2993_v24, %v3170_v8  ;;  %2493 = vlog2.f32 %v1238_v36  ;;  %v3429_v44 = vadd.f32 %v534_v27, %v420_v30 }
 0x11e   : > { %1656 = vmatpush1.bf16.msra.mxu0 %v1495_v54  ;;  %v557_v10 = vadd.f32 %v525_v11, %v411_v22  ;;  %2495 = vpow2.f32 %v1123_v6  ;;  %v715_v56 = vadd.f32 %v683_v45, %v569_v59  ;;  %v558_v1 = vadd.f32 %v526_v50, %v412_v4 }
 0x11f   : > { %v2486_v57 = vpop.eup %2485  ;;  %v817_v29 = vmul.f32 %v3003_v32, %v3264_v47  ;;  %v818_v40 = vmul.f32 %v3005_v33, %v3264_v47  ;;  %v716_v35 = vadd.f32 %v684_v9, %v570_v0  ;;  %v829_v18 = vmul.f32 %v3003_v32, %v3038_v34 }
 0x120   : > { %1602 = vperm.xlu1 %2440, %v1524_v37   ;;  %v3437_v8 = vpop.eup %2487  ;;  %v830_v63 = vmul.f32 %v3005_v33, %v3038_v34  ;;  %v1247_v48 = vadd.f32 1.0, %v2486_v57  ;;  %v703_v21 = vadd.f32 %v671_v28, %v557_v10  ;;  %v704_v39 = vadd.f32 %v672_v42, %v558_v1 }
 0x121   : > { %v3435_v5 = vpop.permute.xlu1 %760  ;;  %v1256_v41 = vadd.f32 1.0, %v3437_v8  ;;  %v1232_v53 = vmul.f32 -0.5, %v3386_v13  ;;  %v1241_v3 = vmul.f32 -0.5, %v3389_v49  ;;  %v3448_v45 = vadd.f32 %v829_v18, %v715_v56 }
 0x122   : > { %2497 = vlog2.f32 %v1247_v48  ;;  %v849_v47 = vadd.f32 %v817_v29, %v703_v21  ;;  %v850_v58 = vadd.f32 %v818_v40, %v704_v39  ;;  %v3450_v9 = vadd.f32 %v830_v63, %v716_v35 }
 0x123   : > { %2499 = vlog2.f32 %v1256_v41  ;;  %v1250_v34 = vmul.f32 -0.5, %v2486_v57  ;;  %v1005_v36 = vmax.f32 %v3292_v60, 0.0  ;;  %v1259_v54 = vmul.f32 -0.5, %v3437_v8 }
 0x124   : > { %v3445_v26 = vpop.eup %2489  ;;  %v1006_v50 = vmax.f32 %v3295_v16, 0.0  ;;  %v1233_v6 = vadd.f32 1.0, %v1232_v53  ;;  %v1235_v59 = vand.u32 2147483647, %v3386_v13  ;;  %v1244_v0 = vand.u32 2147483647, %v3389_v49 }
 0x125   : > { %v1242_v27 = vadd.f32 1.0, %v1241_v3  ;;  %v1007_v37 = vmax.f32 %v3334_v20, 0.0  ;;  %v1283_v60 = vadd.f32 1.0, %v3445_v26  ;;  %v1251_v42 = vadd.f32 1.0, %v1250_v34 }
 0x126   : > { %v918_v43 = vpop.permute.xlu1 %917  ;;  %v2492_v11 = vpop.eup %2491  ;;  %v1253_v10 = vand.u32 2147483647, %v2486_v57  ;;  %v1260_v1 = vadd.f32 1.0, %v1259_v54  ;;  %v1234_v18 = vmul.f32 %v3386_v13, %v1233_v6  ;;  %vm3471_vm8 = vcmp.lt.f32.partialorder %v1235_v59, 0.0004427343 }
 0x127   : > { %v3452_v31 = vadd.f32 %v918_v43, %v849_v47  ;;  %v3454_v38 = vadd.f32 %v918_v43, %v850_v58  ;;  %v2494_v51 = vpop.eup %2493  ;;  %v1231_v28 = vmul.f32 0.6931472, %v2492_v11  ;;  %v1262_v63 = vand.u32 2147483647, %v3437_v8 }
 0x128   : > { %v3461_v30 = vpop.eup %2495  ;;  %v1240_v56 = vmul.f32 0.6931472, %v2494_v51  ;;  %v1243_v21 = vmul.f32 %v3389_v49, %v1242_v27  ;;  %vm3477_vm9 = vcmp.lt.f32.partialorder %v1244_v0, 0.0004427343  ;;  %v1252_v3 = vmul.f32 %v2486_v57, %v1251_v42 }
 0x129   : > { %v1041_v22 = vand.u32 2147483647, %v3452_v31  ;;  %v1042_v4 = vand.u32 2147483647, %v3454_v38  ;;  %v1292_v35 = vadd.f32 1.0, %v3461_v30  ;;  %v1237_v58 = vsel %vm3471_vm8, %v1234_v18, %v1231_v28 }
 0x12a   : > { %vm1254_vm10 = vcmp.lt.f32.partialorder %v1253_v10, 0.0004427343  ;;  %v1246_v34 = vsel %vm3477_vm9, %v1243_v21, %v1240_v56  ;;  %v1261_v49 = vmul.f32 %v3437_v8, %v1260_v1  ;;  %v1008_v54 = vmax.f32 %v3340_v7, 0.0 }
 0x12b   : > { %v3467_v16 = vpop.permute.xlu1 %618  ;;  %v1073_v29 = vsub.f32 0.0, %v1041_v22  ;;  %v1074_v40 = vsub.f32 0.0, %v1042_v4  ;;  %vm1263_vm11 = vcmp.lt.f32.partialorder %v1262_v63, 0.0004427343  ;;  %v1453_v6 = vadd.f32 %v1237_v58, %v1005_v36 }
 0x12c   : > { %v2498_v48 = vpop.eup %2497  ;;  %v1454_v57 = vadd.f32 %v1246_v34, %v1006_v50  ;;  %v421_v22 = vmul.f32 %v2978_v15, %v3258_v25  ;;  %v422_v8 = vmul.f32 %v2980_v17, %v3258_v25  ;;  %v535_v7 = vmul.f32 %v2974_v12, %v3412_v55 }
 0x12d   : > { %v1117_v41 = vmul.f32 1.442695, %v1073_v29  ;;  %v1119_v53 = vmul.f32 1.442695, %v1074_v40  ;;  %v2500_v47 = vpop.eup %2499  ;;  %v1249_v13 = vmul.f32 0.6931472, %v2498_v48  ;;  %v536_v36 = vmul.f32 %v2976_v14, %v3412_v55 }
 0x12e   : > { %v1258_v11 = vmul.f32 0.6931472, %v2500_v47  ;;  %v827_v42 = vmul.f32 %v3003_v32, %v3031_v62  ;;  %v567_v10 = vadd.f32 %v535_v7, %v421_v22  ;;  %v828_v29 = vmul.f32 %v3005_v33, %v3031_v62  ;;  %v3521_v47 = vpop.permute.xlu0 %377 }
 0x12f   : > { %v623_v43 = vpop.permute.xlu1 %622  ;;  %2501 = vpow2.f32 %v1117_v41  ;;  %v1255_v51 = vsel %vm1254_vm10, %v1252_v3, %v1249_v13  ;;  %v568_v56 = vadd.f32 %v536_v36, %v422_v8  ;;  %v417_v55 = vmul.f32 %v2978_v15, %v3201_v52 }
 0x130   : > { %2503 = vpow2.f32 %v1119_v53  ;;  %v1264_v59 = vsel %vm1263_vm11, %v1261_v49, %v1258_v11  ;;  %v1455_v0 = vadd.f32 %v1255_v51, %v1007_v37  ;;  %v681_v37 = vmul.f32 %v2991_v23, %v623_v43  ;;  %v4537_v49 = vld [vmem:[#allocation5_spill] sm:$0xff] }
 0x131   : > { %2505 = vlog2.f32 %v1283_v60  ;;  %v1456_v27 = vadd.f32 %v1264_v59, %v1008_v54  ;;  %v682_v50 = vmul.f32 %v2993_v24, %v623_v43  ;;  %v1286_v40 = vmul.f32 -0.5, %v3445_v26 }
 0x132   : > { %2507 = vlog2.f32 %v1292_v35  ;;  %v1497_v4 = vpack.c.bf16 %v1455_v0, %v1453_v6  ;;  %v1295_v35 = vmul.f32 -0.5, %v3461_v30  ;;  %v418_v20 = vmul.f32 %v2980_v17, %v3201_v52 }
 0x133   : > { %v1498_v60 = vpack.c.bf16 %v1456_v27, %v1454_v57  ;;  %v713_v48 = vadd.f32 %v681_v37, %v567_v10  ;;  %v714_v21 = vadd.f32 %v682_v50, %v568_v56  ;;  %v1011_v41 = vmax.f32 %v3297_v46, 0.0  ;;  %v943_v56 = vpop.permute.xlu0 %942 }
 0x134   : > { %v3489_v28 = vpop.permute.xlu1 %367  ;;  %v531_v62 = vmul.f32 %v2974_v12, %v3235_v2  ;;  %v532_v53 = vmul.f32 %v2976_v14, %v3235_v2  ;;  %v1012_v52 = vmax.f32 %v3322_v61, 0.0  ;;  %v1289_v3 = vand.u32 2147483647, %v3445_v26 }
 0x135   : > { %1657 = vmatprep.subr.bf16.mxu0 %v1498_v60  ;;  %v1298_v43 = vand.u32 2147483647, %v3461_v30  ;;  %v1287_v34 = vadd.f32 1.0, %v1286_v40  ;;  %v1296_v11 = vadd.f32 1.0, %v1295_v35  ;;  %v677_v54 = vmul.f32 %v2991_v23, %v4537_v49 }
 0x136   : > { %1658 = vmatpush1.bf16.msra.mxu0 %v1497_v4  ;;  %v678_v2 = vmul.f32 %v2993_v24, %v4537_v49  ;;  %v859_v59 = vadd.f32 %v827_v42, %v713_v48  ;;  %v860_v0 = vadd.f32 %v828_v29, %v714_v21  ;;  %v563_v22 = vadd.f32 %v531_v62, %v417_v55  ;;  %v4542_v48 = vld [vmem:[#allocation3_spill] sm:$0xff]  ;;  %v4543_v21 = vld [vmem:[#allocation4_spill] sm:$0xff] }
 0x137   : > { %v564_v4 = vadd.f32 %v532_v53, %v418_v20  ;;  %vm3534_vm12 = vcmp.lt.f32.partialorder %v1289_v3, 0.0004427343  ;;  %vm3538_vm13 = vcmp.lt.f32.partialorder %v1298_v43, 0.0004427343  ;;  %v823_v36 = vmul.f32 %v3003_v32, %v3435_v5 }
 0x138   : > { %v1288_v37 = vmul.f32 %v3445_v26, %v1287_v34  ;;  %v1297_v50 = vmul.f32 %v3461_v30, %v1296_v11  ;;  %v709_v42 = vadd.f32 %v677_v54, %v563_v22  ;;  %v824_v10 = vmul.f32 %v3005_v33, %v3435_v5 }
 0x139   : > { %v3501_v1 = vpop.permute.xlu1 %484  ;;  %v3503_v25 = vpop.eup %2501  ;;  %v710_v29 = vadd.f32 %v678_v2, %v564_v4  ;;  %v3549_v40 = vadd.f32 %v943_v56, %v859_v59  ;;  %v3551_v35 = vadd.f32 %v943_v56, %v860_v0  ;;  %v1009_v5 = vmax.f32 %v3452_v31, 0.0 }
 0x13a   : > { %v3511_v18 = vpop.eup %2503  ;;  %v1265_v63 = vadd.f32 1.0, %v3503_v25  ;;  %v1268_v6 = vmul.f32 -0.5, %v3503_v25  ;;  %v1271_v62 = vand.u32 2147483647, %v3503_v25  ;;  %v1010_v49 = vmax.f32 %v3454_v38, 0.0 }
 0x13b   : > { %v2506_v39 = vpop.eup %2505  ;;  %v1274_v58 = vadd.f32 1.0, %v3511_v18  ;;  %v1277_v60 = vmul.f32 -0.5, %v3511_v18  ;;  %v856_v34 = vadd.f32 %v824_v10, %v710_v29  ;;  %v1051_v2 = vand.u32 2147483647, %v3549_v40 }
 0x13c   : > { %v2508_v13 = vpop.eup %2507  ;;  %2509 = vlog2.f32 %v1265_v63  ;;  %v1285_v57 = vmul.f32 0.6931472, %v2506_v39  ;;  %v1269_v55 = vadd.f32 1.0, %v1268_v6  ;;  %v1052_v31 = vand.u32 2147483647, %v3551_v35 }
 0x13d   : > { %2511 = vlog2.f32 %v1274_v58  ;;  %v1294_v27 = vmul.f32 0.6931472, %v2508_v13  ;;  %v1278_v53 = vadd.f32 1.0, %v1277_v60  ;;  %v855_v58 = vadd.f32 %v823_v36, %v709_v42 }
 0x13e   : > { %v3529_v51 = vpop.permute.xlu1 %764  ;;  %v1291_v63 = vsel %vm3534_vm12, %v1288_v37, %v1285_v57  ;;  %v1280_v13 = vand.u32 2147483647, %v3511_v18  ;;  %v1270_v54 = vmul.f32 %v3503_v25, %v1269_v55  ;;  %vm1272_vm14 = vcmp.lt.f32.partialorder %v1271_v62, 0.0004427343 }
 0x13f   : > { %v1300_v26 = vsel %vm3538_vm13, %v1297_v50, %v1294_v27  ;;  %v1279_v8 = vmul.f32 %v3511_v18, %v1278_v53  ;;  %v1459_v60 = vadd.f32 %v1291_v63, %v1011_v41  ;;  %v1084_v55 = vsub.f32 0.0, %v1052_v31 }
 0x140   : > { %vm1281_vm15 = vcmp.lt.f32.partialorder %v1280_v13, 0.0004427343  ;;  %v1460_v10 = vadd.f32 %v1300_v26, %v1012_v52 }
 0x143   : > { %v928_v20 = vpop.permute.xlu1 %927 }
 0x144   : > { %v3558_v30 = vadd.f32 %v928_v20, %v4542_v48  ;;  %v3561_v39 = vadd.f32 %v928_v20, %v4543_v21  ;;  %v1083_v48 = vsub.f32 0.0, %v1051_v2  ;;  %v826_v2 = vmul.f32 %v3005_v33, %v3529_v51 }
 0x146   : > { %v1045_v3 = vand.u32 2147483647, %v3558_v30  ;;  %v1046_v43 = vand.u32 2147483647, %v3561_v39  ;;  %v2510_v11 = vpop.eup %2509  ;;  %v1137_v52 = vmul.f32 1.442695, %v1083_v48 }
 0x147   : > { %v933_v6 = vpop.permute.xlu1 %932  ;;  %v2512_v59 = vpop.eup %2511  ;;  %v1267_v0 = vmul.f32 0.6931472, %v2510_v11  ;;  %v540_v11 = vmul.f32 %v2976_v14, %v3501_v1 }
 0x148   : > { %v1077_v57 = vsub.f32 0.0, %v1045_v3  ;;  %v1078_v27 = vsub.f32 0.0, %v1046_v43  ;;  %v3572_v22 = vadd.f32 %v933_v6, %v855_v58  ;;  %v1276_v4 = vmul.f32 0.6931472, %v2512_v59 }
 0x149   : > { %v3575_v7 = vadd.f32 %v933_v6, %v856_v34  ;;  %v1273_v38 = vsel %vm1272_vm14, %v1270_v54, %v1267_v0  ;;  %v679_v3 = vmul.f32 %v2991_v23, %v3467_v16  ;;  %v680_v43 = vmul.f32 %v2993_v24, %v3467_v16 }
 0x14a   : > { %v1125_v25 = vmul.f32 1.442695, %v1077_v57  ;;  %v1127_v36 = vmul.f32 1.442695, %v1078_v27  ;;  %v1282_v37 = vsel %vm1281_vm15, %v1279_v8, %v1276_v4  ;;  %v1457_v50 = vadd.f32 %v1273_v38, %v1009_v5 }
 0x14b   : > { %v1047_v42 = vand.u32 2147483647, %v3572_v22  ;;  %v1458_v56 = vadd.f32 %v1282_v37, %v1010_v49  ;;  %v1048_v18 = vand.u32 2147483647, %v3575_v7  ;;  %v1139_v5 = vmul.f32 1.442695, %v1084_v55 }
 0x14c   : > { %2513 = vpow2.f32 %v1125_v25  ;;  %v631_v29 = vpop.permute.xlu1 %630  ;;  %v1499_v46 = vpack.c.bf16 %v1459_v60, %v1457_v50  ;;  %v539_v49 = vmul.f32 %v2974_v12, %v3501_v1  ;;  %v825_v54 = vmul.f32 %v3003_v32, %v3529_v51 }
 0x14d   : > { %2515 = vpow2.f32 %v1127_v36  ;;  %v1079_v20 = vsub.f32 0.0, %v1047_v42  ;;  %v1080_v21 = vsub.f32 0.0, %v1048_v18  ;;  %v1500_v62 = vpack.c.bf16 %v1460_v10, %v1458_v56 }
 0x14e   : > { %v426_v16 = vmul.f32 %v2980_v17, %v3489_v28  ;;  %v686_v59 = vmul.f32 %v2993_v24, %v631_v29  ;;  %v711_v57 = vadd.f32 %v679_v3, %v3416_v19  ;;  %v712_v1 = vadd.f32 %v680_v43, %v3429_v44 }
 0x14f   : > { %v1129_v41 = vmul.f32 1.442695, %v1079_v20  ;;  %v1131_v63 = vmul.f32 1.442695, %v1080_v21  ;;  %1659 = vmatprep.subr.bf16.mxu0 %v1500_v62  ;;  %v425_v27 = vmul.f32 %v2978_v15, %v3489_v28  ;;  %v685_v38 = vmul.f32 %v2991_v23, %v631_v29 }
 0x150   : > { %1660 = vmatpush1.bf16.msra.mxu0 %v1499_v46  ;;  %v572_v51 = vadd.f32 %v540_v11, %v426_v16  ;;  %v857_v36 = vadd.f32 %v825_v54, %v711_v57  ;;  %v858_v60 = vadd.f32 %v826_v2, %v712_v1  ;;  %v1013_v50 = vmax.f32 %v3558_v30, 0.0 }
 0x151   : > { %2517 = vpow2.f32 %v1129_v41  ;;  %v3583_v61 = vpop.permute.xlu1 %372  ;;  %v571_v25 = vadd.f32 %v539_v49, %v425_v27  ;;  %v1014_v55 = vmax.f32 %v3561_v39, 0.0  ;;  %v1015_v20 = vmax.f32 %v3572_v22, 0.0 }
 0x152   : > { %2519 = vpow2.f32 %v1131_v63  ;;  %v718_v44 = vadd.f32 %v686_v59, %v572_v51  ;;  %v1016_v3 = vmax.f32 %v3575_v7, 0.0 }
 0x153   : > { %2521 = vpow2.f32 %v1139_v5  ;;  %v717_v21 = vadd.f32 %v685_v38, %v571_v25 }
 0x154   : > { %2523 = vpow2.f32 %v1137_v52  ;;  %v953_v52 = vpop.permute.xlu0 %952 }
 0x156   : > { %v3585_v26 = vpop.eup %2513  ;;  %v3587_v53 = vpop.permute.xlu1 %488 }
 0x157   : > { %v3589_v58 = vpop.eup %2515  ;;  %v1301_v13 = vadd.f32 1.0, %v3585_v26  ;;  %v1304_v19 = vmul.f32 -0.5, %v3585_v26  ;;  %v1307_v62 = vand.u32 2147483647, %v3585_v26 }
 0x158   : > { %v1310_v34 = vadd.f32 1.0, %v3589_v58  ;;  %v1313_v10 = vmul.f32 -0.5, %v3589_v58  ;;  %v1316_v46 = vand.u32 2147483647, %v3589_v58 }
 0x159   : > { %2525 = vlog2.f32 %v1301_v13  ;;  %v1305_v13 = vadd.f32 1.0, %v1304_v19  ;;  %vm3641_vm0 = vcmp.lt.f32.partialorder %v1307_v62, 0.0004427343 }
 0x15a   : > { %2527 = vlog2.f32 %v1310_v34  ;;  %v3605_v31 = vpop.permute.xlu1 %492  ;;  %v1314_v22 = vadd.f32 1.0, %v1313_v10  ;;  %vm3645_vm1 = vcmp.lt.f32.partialorder %v1316_v46, 0.0004427343 }
 0x15b   : > { %v2518_v6 = vpop.eup %2517  ;;  %v1306_v51 = vmul.f32 %v3585_v26, %v1305_v13 }
 0x15c   : > { %v3610_v0 = vpop.eup %2519  ;;  %v1319_v4 = vadd.f32 1.0, %v2518_v6  ;;  %v1322_v56 = vmul.f32 -0.5, %v2518_v6  ;;  %v1325_v49 = vand.u32 2147483647, %v2518_v6 }
 0x15d   : > { %v1328_v8 = vadd.f32 1.0, %v3610_v0  ;;  %v3618_v37 = vpop.eup %2521  ;;  %v1331_v48 = vmul.f32 -0.5, %v3610_v0 }
 0x15e   : > { %2529 = vlog2.f32 %v1319_v4  ;;  %v3622_v28 = vpop.eup %2523  ;;  %v1364_v63 = vadd.f32 1.0, %v3618_v37  ;;  %v1323_v11 = vadd.f32 1.0, %v1322_v56  ;;  %vm3655_vm2 = vcmp.lt.f32.partialorder %v1325_v49, 0.0004427343  ;;  %v4550_v4 = vld [vmem:[#allocation2_spill] sm:$0xff] }
 0x15f   : > { %2531 = vlog2.f32 %v1328_v8  ;;  %v777_v42 = vpop.permute.xlu1 %776  ;;  %v1355_v39 = vadd.f32 1.0, %v3622_v28  ;;  %v1332_v59 = vadd.f32 1.0, %v1331_v48  ;;  %v1334_v8 = vand.u32 2147483647, %v3610_v0 }
 0x160   : > { %v831_v18 = vmul.f32 %v3003_v32, %v777_v42  ;;  %v832_v29 = vmul.f32 %v3005_v33, %v777_v42  ;;  %2533 = vlog2.f32 %v1364_v63  ;;  %v1324_v19 = vmul.f32 %v2518_v6, %v1323_v11 }
 0x161   : > { %vm1335_vm3 = vcmp.lt.f32.partialorder %v1334_v8, 0.0004427343  ;;  %2535 = vlog2.f32 %v1355_v39  ;;  %v833_v39 = vmul.f32 %v3003_v32, %v4550_v4  ;;  %v834_v30 = vmul.f32 %v3005_v33, %v4550_v4 }
 0x162   : > { %v864_v41 = vadd.f32 %v832_v29, %v718_v44  ;;  %v863_v43 = vadd.f32 %v831_v18, %v717_v21  ;;  %v1333_v18 = vmul.f32 %v3610_v0, %v1332_v59 }
 0x163   : > { %v2526_v5 = vpop.eup %2525 }
 0x164   : > { %v2528_v34 = vpop.eup %2527  ;;  %v3635_v54 = vadd.f32 %v953_v52, %v864_v41  ;;  %v938_v2 = vpop.permute.xlu1 %937  ;;  %v1303_v16 = vmul.f32 0.6931472, %v2526_v5  ;;  %v3651_v38 = vadd.f32 %v953_v52, %v863_v43 }
 0x165   : > { %v3637_v57 = vadd.f32 %v938_v2, %v857_v36  ;;  %v3639_v1 = vadd.f32 %v938_v2, %v858_v60  ;;  %v1312_v7 = vmul.f32 0.6931472, %v2528_v34  ;;  %v1315_v60 = vmul.f32 %v3589_v58, %v1314_v22 }
 0x166   : > { %v1056_v25 = vand.u32 2147483647, %v3635_v54  ;;  %v1309_v26 = vsel %vm3641_vm0, %v1306_v51, %v1303_v16  ;;  %v1055_v41 = vand.u32 2147483647, %v3651_v38  ;;  %v1367_v2 = vmul.f32 -0.5, %v3618_v37 }
 0x167   : > { %v1049_v42 = vand.u32 2147483647, %v3637_v57  ;;  %v1050_v29 = vand.u32 2147483647, %v3639_v1  ;;  %v1318_v58 = vsel %vm3645_vm1, %v1315_v60, %v1312_v7  ;;  %v1461_v0 = vadd.f32 %v1309_v26, %v1013_v50 }
 0x168   : > { %v2530_v36 = vpop.eup %2529  ;;  %v1088_v21 = vsub.f32 0.0, %v1056_v25  ;;  %v1462_v43 = vadd.f32 %v1318_v58, %v1014_v55  ;;  %v1087_v16 = vsub.f32 0.0, %v1055_v41  ;;  %v541_v50 = vmul.f32 %v2974_v12, %v3587_v53 }
 0x169   : > { %v2532_v10 = vpop.eup %2531  ;;  %v1321_v56 = vmul.f32 0.6931472, %v2530_v36  ;;  %v635_v48 = vpop.permute.xlu1 %634  ;;  %v1081_v62 = vsub.f32 0.0, %v1049_v42  ;;  %v1082_v63 = vsub.f32 0.0, %v1050_v29  ;;  %v542_v55 = vmul.f32 %v2976_v14, %v3587_v53 }
 0x16a   : > { %v1330_v6 = vmul.f32 0.6931472, %v2532_v10  ;;  %v1147_v49 = vmul.f32 1.442695, %v1088_v21  ;;  %v2534_v7 = vpop.eup %2533  ;;  %v1368_v8 = vadd.f32 1.0, %v1367_v2  ;;  %v428_v36 = vmul.f32 %v2980_v17, %v3583_v61 }
 0x16b   : > { %v1327_v46 = vsel %vm3655_vm2, %v1324_v19, %v1321_v56  ;;  %v1133_v13 = vmul.f32 1.442695, %v1081_v62  ;;  %v1135_v22 = vmul.f32 1.442695, %v1082_v63  ;;  %v1370_v25 = vand.u32 2147483647, %v3618_v37  ;;  %v2536_v58 = vpop.eup %2535 }
 0x16c   : > { %v1336_v5 = vsel %vm1335_vm3, %v1333_v18, %v1330_v6  ;;  %v1463_v52 = vadd.f32 %v1327_v46, %v1015_v20  ;;  %v1358_v20 = vmul.f32 -0.5, %v3622_v28  ;;  %v1145_v60 = vmul.f32 1.442695, %v1087_v16 }
 0x16d   : > { %v1464_v34 = vadd.f32 %v1336_v5, %v1016_v3  ;;  %v639_v11 = vpop.permute.xlu1 %638  ;;  %2537 = vpow2.f32 %v1133_v13  ;;  %v427_v3 = vmul.f32 %v2978_v15, %v3583_v61  ;;  %v687_v19 = vmul.f32 %v2991_v23, %v635_v48 }
 0x16e   : > { %2539 = vpow2.f32 %v1135_v22  ;;  %v1501_v27 = vpack.c.bf16 %v1463_v52, %v1461_v0  ;;  %v688_v44 = vmul.f32 %v2993_v24, %v635_v48  ;;  %v429_v53 = vmul.f32 %v2978_v15, %v3521_v47 }
 0x16f   : > { %v1502_v59 = vpack.c.bf16 %v1464_v34, %v1462_v43  ;;  %2541 = vpow2.f32 %v1147_v49  ;;  %v430_v42 = vmul.f32 %v2980_v17, %v3521_v47  ;;  %v1359_v10 = vadd.f32 1.0, %v1358_v20 }
 0x170   : > { %v1361_v26 = vand.u32 2147483647, %v3622_v28  ;;  %v573_v56 = vadd.f32 %v541_v50, %v427_v3  ;;  %v574_v18 = vadd.f32 %v542_v55, %v428_v36  ;;  %v543_v29 = vmul.f32 %v2974_v12, %v3605_v31 }
 0x171   : > { %1661 = vmatprep.subr.bf16.mxu0 %v1502_v59  ;;  %v1020_v61 = vmax.f32 %v3551_v35, 0.0  ;;  %v544_v48 = vmul.f32 %v2976_v14, %v3605_v31  ;;  %v3699_v6 = vmul.f32 %v3618_v37, %v1368_v8  ;;  %vm3701_vm4 = vcmp.lt.f32.partialorder %v1370_v25, 0.0004427343 }
 0x172   : > { %1662 = vmatpush1.bf16.msra.mxu0 %v1501_v27  ;;  %v785_v51 = vpop.permute.xlu1 %784  ;;  %v1019_v17 = vmax.f32 %v3549_v40, 0.0  ;;  %2543 = vpow2.f32 %v1145_v60  ;;  %v719_v47 = vadd.f32 %v687_v19, %v573_v56  ;;  %v720_v21 = vadd.f32 %v688_v44, %v574_v18 }
 0x173   : > { %v689_v12 = vmul.f32 %v2991_v23, %v639_v11  ;;  %v690_v41 = vmul.f32 %v2993_v24, %v639_v11  ;;  %v3714_v31 = vmul.f32 %v3622_v28, %v1359_v10  ;;  %vm3716_vm5 = vcmp.lt.f32.partialorder %v1361_v26, 0.0004427343 }
 0x174   : > { %v575_v5 = vadd.f32 %v543_v29, %v429_v53  ;;  %v835_v52 = vmul.f32 %v3003_v32, %v785_v51  ;;  %v576_v24 = vadd.f32 %v544_v48, %v430_v42  ;;  %v836_v28 = vmul.f32 %v3005_v33, %v785_v51 }
 0x175   : > { %v3729_v0 = vmul.f32 0.6931472, %v2534_v7  ;;  %v865_v22 = vadd.f32 %v833_v39, %v719_v47  ;;  %v866_v11 = vadd.f32 %v834_v30, %v720_v21 }
 0x176   : > { %v721_v43 = vadd.f32 %v689_v12, %v575_v5  ;;  %v722_v2 = vadd.f32 %v690_v41, %v576_v24  ;;  %v1017_v12 = vmax.f32 %v3637_v57, 0.0 }
 0x177   : > { %v948_v62 = vpop.permute.xlu1 %947  ;;  %v3707_v46 = vpop.eup %2537  ;;  %v1372_v3 = vsel %vm3701_vm4, %v3699_v6, %v3729_v0 }
 0x178   : > { %v3711_v14 = vadd.f32 %v948_v62, %v3448_v45  ;;  %v3720_v63 = vpop.eup %2539  ;;  %v1337_v23 = vadd.f32 1.0, %v3707_v46  ;;  %v3725_v13 = vadd.f32 %v948_v62, %v3450_v9  ;;  %v1357_v9 = vmul.f32 0.6931472, %v2536_v58 }
 0x179   : > { %v1346_v45 = vadd.f32 1.0, %v3720_v63  ;;  %v3731_v49 = vpop.eup %2541  ;;  %v867_v33 = vadd.f32 %v835_v52, %v721_v43  ;;  %v1340_v7 = vmul.f32 -0.5, %v3707_v46  ;;  %v1349_v20 = vmul.f32 -0.5, %v3720_v63 }
 0x17a   : > { %2545 = vlog2.f32 %v1337_v23  ;;  %v1053_v32 = vand.u32 2147483647, %v3711_v14  ;;  %v1054_v16 = vand.u32 2147483647, %v3725_v13  ;;  %v868_v39 = vadd.f32 %v836_v28, %v722_v2 }
 0x17b   : > { %v958_v34 = vpop.permute.xlu1 %957  ;;  %2547 = vlog2.f32 %v1346_v45  ;;  %v1400_v51 = vadd.f32 1.0, %v3731_v49  ;;  %v1343_v44 = vand.u32 2147483647, %v3707_v46  ;;  %v1363_v10 = vsel %vm3716_vm5, %v3714_v31, %v1357_v9 }
 0x17c   : > { %v3735_v59 = vadd.f32 %v958_v34, %v865_v22  ;;  %v3737_v27 = vadd.f32 %v958_v34, %v866_v11  ;;  %v1085_v4 = vsub.f32 0.0, %v1053_v32  ;;  %v1086_v30 = vsub.f32 0.0, %v1054_v16  ;;  %v3752_v19 = vpop.eup %2543 }
 0x17d   : > { %v1341_v26 = vadd.f32 1.0, %v1340_v7  ;;  %v1350_v56 = vadd.f32 1.0, %v1349_v20  ;;  %v1352_v6 = vand.u32 2147483647, %v3720_v63  ;;  %v1391_v47 = vadd.f32 1.0, %v3752_v19 }
 0x17e   : > { %v1057_v50 = vand.u32 2147483647, %v3735_v59  ;;  %v1141_v8 = vmul.f32 1.442695, %v1085_v4  ;;  %v1058_v25 = vand.u32 2147483647, %v3737_v27  ;;  %v1467_v34 = vadd.f32 %v1363_v10, %v1019_v17 }
 0x17f   : > { %v963_v55 = vpop.permute.xlu1 %962  ;;  %v1143_v53 = vmul.f32 1.442695, %v1086_v30  ;;  %v1342_v5 = vmul.f32 %v3707_v46, %v1341_v26  ;;  %vm1344_vm6 = vcmp.lt.f32.partialorder %v1343_v44, 0.0004427343  ;;  %v1351_v52 = vmul.f32 %v3720_v63, %v1350_v56 }
 0x180   : > { %v3748_v36 = vadd.f32 %v963_v55, %v867_v33  ;;  %v3750_v60 = vadd.f32 %v963_v55, %v868_v39  ;;  %v1089_v42 = vsub.f32 0.0, %v1057_v50  ;;  %2549 = vpow2.f32 %v1141_v8 }
 0x181   : > { %v1090_v18 = vsub.f32 0.0, %v1058_v25  ;;  %2551 = vpow2.f32 %v1143_v53  ;;  %v1018_v28 = vmax.f32 %v3639_v1, 0.0  ;;  %vm1353_vm7 = vcmp.lt.f32.partialorder %v1352_v6, 0.0004427343 }
 0x182   : > { %v1149_v29 = vmul.f32 1.442695, %v1089_v42  ;;  %v1059_v58 = vand.u32 2147483647, %v3748_v36  ;;  %v1060_v48 = vand.u32 2147483647, %v3750_v60  ;;  %2553 = vlog2.f32 %v1400_v51 }
 0x183   : > { %v1151_v15 = vmul.f32 1.442695, %v1090_v18  ;;  %v1468_v46 = vadd.f32 %v1372_v3, %v1020_v61  ;;  %v1403_v32 = vmul.f32 -0.5, %v3731_v49  ;;  %v1394_v40 = vmul.f32 -0.5, %v3752_v19 }
 0x184   : > { %v2546_v21 = vpop.eup %2545  ;;  %2555 = vpow2.f32 %v1149_v29  ;;  %v1091_v62 = vsub.f32 0.0, %v1059_v58  ;;  %v1092_v41 = vsub.f32 0.0, %v1060_v48  ;;  %v1406_v20 = vand.u32 2147483647, %v3731_v49 }
 0x185   : > { %v2548_v31 = vpop.eup %2547  ;;  %v1339_v37 = vmul.f32 0.6931472, %v2546_v21  ;;  %2557 = vpow2.f32 %v1151_v15  ;;  %v1404_v61 = vadd.f32 1.0, %v1403_v32  ;;  %v1023_v3 = vmax.f32 %v3651_v38, 0.0 }
 0x186   : > { %v1348_v23 = vmul.f32 0.6931472, %v2548_v31  ;;  %v1153_v24 = vmul.f32 1.442695, %v1091_v62  ;;  %v1155_v45 = vmul.f32 1.442695, %v1092_v41  ;;  %2559 = vlog2.f32 %v1391_v47  ;;  %v1528_v41 = vpop.permute.xlu0 %1527 }
 0x187   : > { %v1345_v0 = vsel %vm1344_vm6, %v1342_v5, %v1339_v37  ;;  %v1397_v8 = vand.u32 2147483647, %v3752_v19  ;;  %v1405_v53 = vmul.f32 %v3731_v49, %v1404_v61  ;;  %vm3787_vm8 = vcmp.lt.f32.partialorder %v1406_v20, 0.0004427343 }
 0x188   : > { %v1354_v57 = vsel %vm1353_vm7, %v1351_v52, %v1348_v23  ;;  %v1465_v43 = vadd.f32 %v1345_v0, %v1017_v12  ;;  %2561 = vpow2.f32 %v1153_v24  ;;  %v1395_v10 = vadd.f32 1.0, %v1394_v40 }
 0x189   : > { %v1466_v22 = vadd.f32 %v1354_v57, %v1018_v28  ;;  %2563 = vpow2.f32 %v1155_v45  ;;  %v1024_v26 = vmax.f32 %v3635_v54, 0.0  ;;  %v1021_v6 = vmax.f32 %v3711_v14, 0.0 }
 0x18a   : > { %v1503_v11 = vpack.c.bf16 %v1467_v34, %v1465_v43  ;;  %v2550_v63 = vpop.eup %2549  ;;  %v1022_v47 = vmax.f32 %v3725_v13, 0.0  ;;  %v1396_v12 = vmul.f32 %v3752_v19, %v1395_v10  ;;  %vm3809_vm11 = vcmp.lt.f32.partialorder %v1397_v8, 0.0004427343 }
 0x18b   : > { %v1504_v2 = vpack.c.bf16 %v1468_v46, %v1466_v22  ;;  %v2552_v1 = vpop.eup %2551  ;;  %v1373_v9 = vadd.f32 1.0, %v2550_v63  ;;  %v1376_v30 = vmul.f32 -0.5, %v2550_v63  ;;  %v1379_v56 = vand.u32 2147483647, %v2550_v63 }
 0x18c   : > { %v2554_v16 = vpop.eup %2553  ;;  %v1382_v33 = vadd.f32 1.0, %v2552_v1  ;;  %v1385_v51 = vmul.f32 -0.5, %v2552_v1  ;;  %v1388_v18 = vand.u32 2147483647, %v2552_v1 }
 0x18d   : > { %1663 = vmatprep.subr.bf16.mxu0 %v1504_v2  ;;  %2565 = vlog2.f32 %v1373_v9  ;;  %v1402_v50 = vmul.f32 0.6931472, %v2554_v16  ;;  %v1377_v29 = vadd.f32 1.0, %v1376_v30  ;;  %vm3801_vm9 = vcmp.lt.f32.partialorder %v1379_v56, 0.0004427343 }
 0x18e   : > { %v3771_v7 = vpop.eup %2555  ;;  %1664 = vmatpush1.bf16.msra.mxu0 %v1503_v11  ;;  %2567 = vlog2.f32 %v1382_v33  ;;  %v1386_v49 = vadd.f32 1.0, %v1385_v51  ;;  %vm3805_vm10 = vcmp.lt.f32.partialorder %v1388_v18, 0.0004427343 }
 0x18f   : > { %v3774_v17 = vpop.eup %2557  ;;  %v1409_v35 = vadd.f32 1.0, %v3771_v7  ;;  %v1408_v58 = vsel %vm3787_vm8, %v1405_v53, %v1402_v50  ;;  %v1412_v15 = vmul.f32 -0.5, %v3771_v7  ;;  %v1378_v23 = vmul.f32 %v2550_v63, %v1377_v29 }
 0x190   : > { %v1418_v4 = vadd.f32 1.0, %v3774_v17  ;;  %v2560_v39 = vpop.eup %2559  ;;  %v1421_v54 = vmul.f32 -0.5, %v3774_v17  ;;  %v1472_v14 = vadd.f32 %v1408_v58, %v1024_v26  ;;  %v1387_v45 = vmul.f32 %v2552_v1, %v1386_v49  ;;  %v2443_v49 = vld [vmem:[%s4499_s3 + $0x10] sm:$0xff]  }
 0x191   : > { %2569 = vlog2.f32 %v1409_v35  ;;  %v1393_v48 = vmul.f32 0.6931472, %v2560_v39  ;;  %v1413_v28 = vadd.f32 1.0, %v1412_v15  ;;  %v1415_v0 = vand.u32 2147483647, %v3771_v7  ;;  %v2444_v15 = vld [vmem:[%s4499_s3 + $0x18] sm:$0xff]  }
 0x192   : > { %v3779_v55 = vpop.eup %2561  ;;  %2571 = vlog2.f32 %v1418_v4  ;;  %v1422_v34 = vadd.f32 1.0, %v1421_v54  ;;  %v1424_v22 = vand.u32 2147483647, %v3774_v17  ;;  %v1025_v35 = vmax.f32 %v3735_v59, 0.0  ;;  %v2446_v54 = vld [vmem:[%s4499_s3 + $0x28] sm:$0xff]  }
 0x193   : > { %v3783_v25 = vpop.eup %2563  ;;  %v1427_v44 = vadd.f32 1.0, %v3779_v55  ;;  %v1430_v21 = vmul.f32 -0.5, %v3779_v55  ;;  %v1399_v19 = vsel %vm3809_vm11, %v1396_v12, %v1393_v48  ;;  %v1433_v33 = vand.u32 2147483647, %v3779_v55  ;;  %v2448_v12 = vld [vmem:[%s4499_s3 + $0x38] sm:$0xff]  }
 0x194   : > { %v1436_v38 = vadd.f32 1.0, %v3783_v25  ;;  %v1439_v52 = vmul.f32 -0.5, %v3783_v25  ;;  %v1471_v9 = vadd.f32 %v1399_v19, %v1023_v3  ;;  %v1414_v61 = vmul.f32 %v3771_v7, %v1413_v28 }
 0x195   : > { %2573 = vlog2.f32 %v1427_v44  ;;  %v1431_v46 = vadd.f32 1.0, %v1430_v21  ;;  %v1442_v20 = vand.u32 2147483647, %v3783_v25  ;;  %vm3826_vm12 = vcmp.lt.f32.partialorder %v1415_v0, 0.0004427343  ;;  %v2447_v21 = vld [vmem:[%s4499_s3 + $0x30] sm:$0xff]  }
 0x196   : > { %2575 = vlog2.f32 %v1436_v38  ;;  %v1440_v40 = vadd.f32 1.0, %v1439_v52  ;;  %v1423_v50 = vmul.f32 %v3774_v17, %v1422_v34  ;;  %v1027_v3 = vmax.f32 %v3748_v36, 0.0 }
 0x197   : > { %v2566_v62 = vpop.eup %2565  ;;  %vm3834_vm13 = vcmp.lt.f32.partialorder %v1424_v22, 0.0004427343  ;;  %v1432_v53 = vmul.f32 %v3779_v55, %v1431_v46  ;;  %vm1434_vm14 = vcmp.lt.f32.partialorder %v1433_v33, 0.0004427343  ;;  %v1026_v36 = vmax.f32 %v3737_v27, 0.0 }
 0x198   : > { %v2568_v13 = vpop.eup %2567  ;;  %v1375_v5 = vmul.f32 0.6931472, %v2566_v62  ;;  %v1441_v17 = vmul.f32 %v3783_v25, %v1440_v40  ;;  %v1028_v26 = vmax.f32 %v3750_v60, 0.0  ;;  %vm1443_vm15 = vcmp.lt.f32.partialorder %v1442_v20, 0.0004427343  ;;  %v2441_v25 = vld [vmem:[%s4499_s3] sm:$0xff]  }
 0x199   : > { %v1384_v24 = vmul.f32 0.6931472, %v2568_v13  ;;  %v4567_v27 = vmov 0   ;;  %v2442_v60 = vld [vmem:[%s4499_s3 + $0x8] sm:$0xff]  }
 0x19a   : > { %v1381_v43 = vsel %vm3801_vm9, %v1378_v23, %v1375_v5  ;;  %v1533_v5 = vpop.permute.xlu1 %1532 }
 0x19b   : > { %v2570_v57 = vpop.eup %2569  ;;  %v1390_v63 = vsel %vm3805_vm10, %v1387_v45, %v1384_v24  ;;  %v1469_v2 = vadd.f32 %v1381_v43, %v1021_v6  ;;  %v1538_v45 = vpop.permute.xlu0 %1537 }
 0x19c   : > { %v2572_v11 = vpop.eup %2571  ;;  %v1411_v32 = vmul.f32 0.6931472, %v2570_v57  ;;  %v1470_v16 = vadd.f32 %v1390_v63, %v1022_v47  ;;  %v2445_v47 = vld [vmem:[%s4499_s3 + $0x20] sm:$0xff]  }
 0x19d   : > { %v1420_v1 = vmul.f32 0.6931472, %v2572_v11  ;;  %v1505_v4 = vpack.c.bf16 %v1471_v9, %v1469_v2 }
 0x19e   : > { %v1506_v51 = vpack.c.bf16 %v1472_v14, %v1470_v16  ;;  %v1417_v44 = vsel %vm3826_vm12, %v1414_v61, %v1411_v32  ;;  %v1543_v22 = vpop.permute.xlu1 %1542 }
 0x19f   : > { %v2574_v39 = vpop.eup %2573  ;;  %v1426_v42 = vsel %vm3834_vm13, %v1423_v50, %v1420_v1  ;;  %v1473_v18 = vadd.f32 %v1417_v44, %v1025_v35 }
 0x1a0   : > { %v2576_v8 = vpop.eup %2575  ;;  %v1429_v7 = vmul.f32 0.6931472, %v2574_v39  ;;  %1665 = vmatprep.subr.bf16.mxu0 %v1506_v51  ;;  %v1474_v58 = vadd.f32 %v1426_v42, %v1026_v36  ;;  %v1548_v51 = vpop.permute.xlu0 %1547 }
 0x1a1   : > { %v1438_v10 = vmul.f32 0.6931472, %v2576_v8  ;;  %1666 = vmatpush1.bf16.msra.mxu0 %v1505_v4 }
 0x1a2   : > { %v1435_v56 = vsel %vm1434_vm14, %v1432_v53, %v1429_v7  ;;  %v1553_v36 = vpop.permute.xlu1 %1552 }
 0x1a3   : > { %v1444_v38 = vsel %vm1443_vm15, %v1441_v17, %v1438_v10  ;;  %v1475_v29 = vadd.f32 %v1435_v56, %v1027_v3 }
 0x1a4   : > { %v1476_v55 = vadd.f32 %v1444_v38, %v1028_v26 }
 0x1a5   : > { %v1507_v48 = vpack.c.bf16 %v1475_v29, %v1473_v18 }
 0x1a6   : > { %v1508_v6 = vpack.c.bf16 %v1476_v55, %v1474_v58 }
 0x1a8   : > { %1667 = vmatprep.subr.bf16.mxu0 %v1508_v6 }
 0x1a9   : > { %1668 = vmatpush1.bf16.msra.mxu0 %v1507_v48 }
 0x1ac   : > { %1686 = vmatmul.mubr.bf16.vlgmr.msra.gmra.mrb[0].mxu0 %v2441_v25 }
 0x1ad   : > { %1695 = vmatprep.mubr.bf16.mxu0 %v4567_v27 }
 0x1b4   : > { %1696 = vmatmul.mubr.bf16.gmra.mrb[4].mxu0 %v2442_v60 }
 0x1b5   : > { %1705 = vmatprep.mubr.bf16.mxu0 %v4567_v27 }
 0x1bc   : > { %1706 = vmatmul.mubr.bf16.gmra.mrb[8].mxu0 %v2443_v49 }
 0x1bd   : > { %1715 = vmatprep.mubr.bf16.mxu0 %v4567_v27 }
 0x1c4   : > { %1716 = vmatmul.mubr.bf16.gmra.mrb[12].mxu0 %v2444_v15 }
 0x1c5   : > { %1725 = vmatprep.mubr.bf16.mxu0 %v4567_v27 }
 0x1cc   : > { %1726 = vmatmul.mubr.bf16.gmra.mrb[16].mxu0 %v2445_v47 }
 0x1cd   : > { %1735 = vmatprep.mubr.bf16.mxu0 %v4567_v27 }
 0x1d4   : > { %1736 = vmatmul.mubr.bf16.gmra.mrb[20].mxu0 %v2446_v54 }
 0x1d5   : > { %1745 = vmatprep.mubr.bf16.mxu0 %v4567_v27 }
 0x1dc   : > { %1746 = vmatmul.mubr.bf16.gmra.mrb[24].mxu0 %v2447_v21  ;;  %v3911_v21 = vpop.permute.xlu0 %1557 }
 0x1dd   : > { %1755 = vmatprep.mubr.bf16.mxu0 %v4567_v27 }
 0x1e4   : > { %1756 = vmatmul.mubr.bf16.gmra.mrb[28].mxu0 %v2448_v12 }
 0x27f   : > { %v1687_v62 = vpop.f32.mrb[0].mxu0 }
 0x280   : > { %v1689_v31 = vpop.f32.mrb[1].mxu0  ;;  %v3880_v19 = vadd.f32 %v1687_v62, %v1528_v41 }
 0x281   : > { %v3875_v14 = vadd.f32 %v1689_v31, %v1528_v41  ;;  %v1691_v37 = vpop.f32.mrb[2].mxu0 }
 0x282   : > { %v1693_v13 = vpop.f32.mrb[3].mxu0  ;;  %4568 = vst [vmem:[#allocation5_spill] sm:$0xff] %v3880_v19  ;;  %v3882_v28 = vadd.f32 %v1691_v37, %v1533_v5  ;;  %v1798_v46 = vand.u32 2147483647, %v3880_v19 }
 0x283   : > { %v1799_v23 = vand.u32 2147483647, %v3875_v14  ;;  %v3878_v52 = vadd.f32 %v1693_v13, %v1533_v5 }
 0x284   : > { %4569 = vst [vmem:[#allocation3_spill] sm:$0xff] %v3882_v28  ;;  %v1800_v1 = vand.u32 2147483647, %v3882_v28  ;;  %v1830_v30 = vsub.f32 0.0, %v1798_v46 }
 0x285   : > { %v1831_v24 = vsub.f32 0.0, %v1799_v23  ;;  %v1801_v57 = vand.u32 2147483647, %v3878_v52 }
 0x286   : > { %v1832_v8 = vsub.f32 0.0, %v1800_v1  ;;  %v1862_v38 = vmul.f32 1.442695, %v1830_v30 }
 0x287   : > { %v1697_v0 = vpop.f32.mrb[4].mxu0  ;;  %v1864_v2 = vmul.f32 1.442695, %v1831_v24  ;;  %v1833_v35 = vsub.f32 0.0, %v1801_v57 }
 0x288   : > { %v3885_v43 = vadd.f32 %v1697_v0, %v1538_v45  ;;  %v1699_v34 = vpop.f32.mrb[5].mxu0  ;;  %v1866_v48 = vmul.f32 1.442695, %v1832_v8 }
 0x289   : > { %v3888_v11 = vadd.f32 %v1699_v34, %v1538_v45  ;;  %v1701_v63 = vpop.f32.mrb[6].mxu0  ;;  %2577 = vpow2.f32 %v1864_v2  ;;  %v1868_v53 = vmul.f32 1.442695, %v1833_v35 }
 0x28a   : > { %v1802_v32 = vand.u32 2147483647, %v3885_v43  ;;  %v3891_v9 = vadd.f32 %v1701_v63, %v1543_v22  ;;  %v1703_v16 = vpop.f32.mrb[7].mxu0 }
 0x28b   : > { %v1803_v33 = vand.u32 2147483647, %v3888_v11  ;;  %v3895_v40 = vadd.f32 %v1703_v16, %v1543_v22 }
 0x28c   : > { %v1834_v61 = vsub.f32 0.0, %v1802_v32  ;;  %v1804_v20 = vand.u32 2147483647, %v3891_v9 }
 0x28d   : > { %v1835_v4 = vsub.f32 0.0, %v1803_v33  ;;  %v1805_v39 = vand.u32 2147483647, %v3895_v40 }
 0x28e   : > { %v1870_v50 = vmul.f32 1.442695, %v1834_v61  ;;  %v1836_v3 = vsub.f32 0.0, %v1804_v20 }
 0x28f   : > { %v1872_v44 = vmul.f32 1.442695, %v1835_v4  ;;  %v1837_v59 = vsub.f32 0.0, %v1805_v39  ;;  %v1707_v7 = vpop.f32.mrb[8].mxu0 }
 0x290   : > { %2579 = vpow2.f32 %v1870_v50  ;;  %v1874_v42 = vmul.f32 1.442695, %v1836_v3  ;;  %v3899_v10 = vadd.f32 %v1707_v7, %v1548_v51  ;;  %v1709_v17 = vpop.f32.mrb[9].mxu0 }
 0x291   : > { %2581 = vpow2.f32 %v1872_v44  ;;  %v1876_v26 = vmul.f32 1.442695, %v1837_v59  ;;  %v3901_v56 = vadd.f32 %v1709_v17, %v1548_v51  ;;  %v1711_v18 = vpop.f32.mrb[10].mxu0 }
 0x292   : > { %2583 = vpow2.f32 %v1874_v42  ;;  %v1806_v29 = vand.u32 2147483647, %v3899_v10  ;;  %v3904_v58 = vadd.f32 %v1711_v18, %v1553_v36  ;;  %v1713_v55 = vpop.f32.mrb[11].mxu0 }
 0x293   : > { %2585 = vpow2.f32 %v1876_v26  ;;  %v1807_v6 = vand.u32 2147483647, %v3901_v56  ;;  %v3907_v25 = vadd.f32 %v1713_v55, %v1553_v36  ;;  %v3913_v31 = vpop.eup %2577 }
 0x294   : > { %2587 = vpow2.f32 %v1868_v53  ;;  %v1838_v27 = vsub.f32 0.0, %v1806_v29  ;;  %v1808_v60 = vand.u32 2147483647, %v3904_v58  ;;  %v1938_v16 = vmul.f32 -0.5, %v3913_v31 }
 0x295   : > { %v1839_v49 = vsub.f32 0.0, %v1807_v6  ;;  %v1809_v15 = vand.u32 2147483647, %v3907_v25  ;;  %2589 = vpow2.f32 %v1862_v38  ;;  %v1935_v50 = vadd.f32 1.0, %v3913_v31 }
 0x296   : > { %v1878_v47 = vmul.f32 1.442695, %v1838_v27  ;;  %v1840_v54 = vsub.f32 0.0, %v1808_v60  ;;  %2591 = vpow2.f32 %v1866_v48  ;;  %v1939_v42 = vadd.f32 1.0, %v1938_v16 }
 0x297   : > { %v1880_v12 = vmul.f32 1.442695, %v1839_v49  ;;  %v1841_v62 = vsub.f32 0.0, %v1809_v15  ;;  %v1717_v41 = vpop.f32.mrb[12].mxu0 }
 0x298   : > { %2593 = vpow2.f32 %v1878_v47  ;;  %v1882_v37 = vmul.f32 1.442695, %v1840_v54  ;;  %v3916_v13 = vadd.f32 %v1717_v41, %v3911_v21  ;;  %v1719_v5 = vpop.f32.mrb[13].mxu0 }
 0x299   : > { %2595 = vpow2.f32 %v1880_v12  ;;  %v1884_v24 = vmul.f32 1.442695, %v1841_v62  ;;  %v3919_v45 = vpop.f32.mrb[14].mxu0 }
 0x29a   : > { %v3921_v0 = vpop.eup %2579  ;;  %2597 = vpow2.f32 %v1882_v37  ;;  %v1810_v22 = vand.u32 2147483647, %v3916_v13  ;;  %v3926_v46 = vpop.f32.mrb[15].mxu0  ;;  %v3978_v37 = vadd.f32 %v1719_v5, %v3911_v21 }
 0x29b   : > { %v3928_v63 = vpop.eup %2581  ;;  %v1962_v32 = vadd.f32 1.0, %v3921_v0  ;;  %2599 = vpow2.f32 %v1884_v24  ;;  %v1965_v51 = vmul.f32 -0.5, %v3921_v0  ;;  %v1968_v48 = vand.u32 2147483647, %v3921_v0 }
 0x29c   : > { %v3933_v1 = vpop.eup %2583  ;;  %v1971_v61 = vadd.f32 1.0, %v3928_v63  ;;  %v1842_v30 = vsub.f32 0.0, %v1810_v22  ;;  %v1974_v36 = vmul.f32 -0.5, %v3928_v63  ;;  %v1977_v47 = vand.u32 2147483647, %v3928_v63 }
 0x29d   : > { %v3939_v4 = vpop.eup %2585  ;;  %2601 = vlog2.f32 %v1962_v32  ;;  %v1980_v39 = vadd.f32 1.0, %v3933_v1  ;;  %v1966_v15 = vadd.f32 1.0, %v1965_v51  ;;  %v1983_v54 = vmul.f32 -0.5, %v3933_v1  ;;  %v1563_v32 = vpop.permute.xlu1 %1562 }
 0x29e   : > { %v3943_v3 = vpop.eup %2587  ;;  %2603 = vlog2.f32 %v1971_v61  ;;  %v1989_v59 = vadd.f32 1.0, %v3939_v4  ;;  %v1886_v6 = vmul.f32 1.442695, %v1842_v30  ;;  %v3981_v24 = vmul.f32 %v3913_v31, %v1939_v42 }
 0x29f   : > { %2605 = vlog2.f32 %v1980_v39  ;;  %v3950_v53 = vpop.f32.mrb[16].mxu0  ;;  %v3952_v17 = vpop.eup %2589  ;;  %v3966_v60 = vadd.f32 1.0, %v3943_v3  ;;  %v1975_v16 = vadd.f32 1.0, %v1974_v36  ;;  %v1986_v61 = vand.u32 2147483647, %v3933_v1 }
 0x2a0   : > { %v3957_v38 = vpop.f32.mrb[17].mxu0  ;;  %v3960_v55 = vpop.eup %2591  ;;  %2607 = vlog2.f32 %v1935_v50  ;;  %v1992_v39 = vmul.f32 -0.5, %v3939_v4  ;;  %vm3990_vm0 = vcmp.lt.f32.partialorder %v1968_v48, 0.0004427343  ;;  %v4000_v42 = vmul.f32 %v3921_v0, %v1966_v15 }
 0x2a1   : > { %v3963_v27 = vpop.f32.mrb[18].mxu0  ;;  %2609 = vlog2.f32 %v1989_v59  ;;  %v3997_v59 = vadd.f32 %v3919_v45, %v1563_v32  ;;  %vm4002_vm1 = vcmp.lt.f32.partialorder %v1977_v47, 0.0004427343  ;;  %v1995_v23 = vand.u32 2147483647, %v3939_v4 }
 0x2a2   : > { %v3968_v49 = vpop.eup %2593  ;;  %v3972_v12 = vpop.f32.mrb[19].mxu0  ;;  %2611 = vpow2.f32 %v1886_v6  ;;  %v1984_v6 = vadd.f32 1.0, %v1983_v54  ;;  %v1811_v57 = vand.u32 2147483647, %v3978_v37  ;;  %v1976_v0 = vmul.f32 %v3928_v63, %v1975_v16 }
 0x2a3   : > { %v3974_v62 = vpop.eup %2595  ;;  %v1998_v41 = vadd.f32 1.0, %v3968_v49  ;;  %v2001_v21 = vmul.f32 -0.5, %v3968_v49  ;;  %vm4013_vm2 = vcmp.lt.f32.partialorder %v1986_v61, 0.0004427343  ;;  %v1993_v47 = vadd.f32 1.0, %v1992_v39 }
 0x2a4   : > { %v3983_v22 = vpop.eup %2597  ;;  %v2007_v5 = vadd.f32 1.0, %v3974_v62  ;;  %v2010_v54 = vmul.f32 -0.5, %v3974_v62  ;;  %v1985_v8 = vmul.f32 %v3933_v1, %v1984_v6  ;;  %vm4028_vm3 = vcmp.lt.f32.partialorder %v1995_v23, 0.0004427343 }
 0x2a5   : > { %v3988_v50 = vpop.eup %2599  ;;  %v2016_v48 = vadd.f32 1.0, %v3983_v22  ;;  %2613 = vlog2.f32 %v1998_v41  ;;  %v2002_v41 = vadd.f32 1.0, %v2001_v21  ;;  %v2019_v26 = vmul.f32 -0.5, %v3983_v22 }
 0x2a6   : > { %v2025_v2 = vadd.f32 1.0, %v3988_v50  ;;  %2615 = vlog2.f32 %v2007_v5  ;;  %v2028_v63 = vmul.f32 -0.5, %v3988_v50  ;;  %v2004_v21 = vand.u32 2147483647, %v3968_v49 }
 0x2a7   : > { %v2602_v34 = vpop.eup %2601  ;;  %v4010_v45 = vpop.f32.mrb[20].mxu0  ;;  %2617 = vlog2.f32 %v2016_v48  ;;  %v1843_v5 = vsub.f32 0.0, %v1811_v57  ;;  %v1994_v6 = vmul.f32 %v3939_v4, %v1993_v47  ;;  %v2011_v48 = vadd.f32 1.0, %v2010_v54 }
 0x2a8   : > { %v2604_v29 = vpop.eup %2603  ;;  %v4018_v30 = vpop.f32.mrb[21].mxu0  ;;  %v1964_v44 = vmul.f32 0.6931472, %v2602_v34  ;;  %2619 = vlog2.f32 %v2025_v2  ;;  %v2013_v35 = vand.u32 2147483647, %v3974_v62  ;;  %v4040_v23 = vmul.f32 %v3968_v49, %v2002_v41 }
 0x2a9   : > { %v2606_v18 = vpop.eup %2605  ;;  %v4024_v16 = vpop.f32.mrb[22].mxu0  ;;  %v1973_v39 = vmul.f32 0.6931472, %v2604_v29  ;;  %v2020_v29 = vadd.f32 1.0, %v2019_v26  ;;  %v1888_v28 = vmul.f32 1.442695, %v1843_v5  ;;  %v4055_v49 = vadd.f32 %v3926_v46, %v1563_v32 }
 0x2aa   : > { %v4026_v61 = vpop.eup %2607  ;;  %v4033_v7 = vpop.f32.mrb[23].mxu0  ;;  %v1982_v1 = vmul.f32 0.6931472, %v2606_v18  ;;  %v1812_v19 = vand.u32 2147483647, %v3997_v59  ;;  %v1970_v57 = vsel %vm3990_vm0, %v4000_v42, %v1964_v44  ;;  %v2029_v18 = vadd.f32 1.0, %v2028_v63 }
 0x2ab   : > { %v2610_v34 = vpop.eup %2609  ;;  %v2022_v2 = vand.u32 2147483647, %v3983_v22  ;;  %v1979_v47 = vsel %vm4002_vm1, %v1976_v0, %v1973_v39  ;;  %vm4050_vm4 = vcmp.lt.f32.partialorder %v2004_v21, 0.0004427343  ;;  %2621 = vpow2.f32 %v1888_v28  ;;  %v1568_v44 = vpop.permute.xlu0 %1567 }
 0x2ac   : > { %v4037_v33 = vpop.eup %2611  ;;  %v1844_v26 = vsub.f32 0.0, %v1812_v19  ;;  %v1988_v51 = vsel %vm4013_vm2, %v1985_v8, %v1982_v1  ;;  %v1991_v42 = vmul.f32 0.6931472, %v2610_v34  ;;  %v4062_v63 = vmul.f32 %v3974_v62, %v2011_v48 }
 0x2ad   : > { %v2034_v4 = vadd.f32 1.0, %v4037_v33  ;;  %v2031_v36 = vand.u32 2147483647, %v3988_v50  ;;  %vm4067_vm5 = vcmp.lt.f32.partialorder %v2013_v35, 0.0004427343  ;;  %v4072_v28 = vmul.f32 %v3983_v22, %v2020_v29 }
 0x2ae   : > { %v2037_v46 = vmul.f32 -0.5, %v4037_v33  ;;  %v1890_v32 = vmul.f32 1.442695, %v1844_v26  ;;  %v4076_v8 = vadd.f32 %v3950_v53, %v1568_v44  ;;  %v4582_v15 = vmax.f32 %v3885_v43, 0.0 }
 0x2af   : > { %v4057_v41 = vpop.f32.mrb[24].mxu0  ;;  %v2614_v39 = vpop.eup %2613  ;;  %v4583_v35 = vmax.f32 %v3888_v11, 0.0  ;;  %vm4088_vm6 = vcmp.lt.f32.partialorder %v2022_v2, 0.0004427343  ;;  %2623 = vlog2.f32 %v2034_v4  ;;  %v1813_v22 = vand.u32 2147483647, %v4055_v49 }
 0x2b0   : > { %v4065_v0 = vpop.f32.mrb[25].mxu0  ;;  %v4082_v21 = vadd.f32 %v1970_v57, %v4582_v15  ;;  %v2616_v53 = vpop.eup %2615  ;;  %v4586_v48 = vmax.f32 %v3891_v9, 0.0  ;;  %v4100_v43 = vmul.f32 %v3988_v50, %v2029_v18  ;;  %2625 = vpow2.f32 %v1890_v32 }
 0x2b1   : > { %v4078_v62 = vpop.f32.mrb[26].mxu0  ;;  %v4086_v5 = vadd.f32 %v1979_v47, %v4583_v35  ;;  %v2618_v57 = vpop.eup %2617  ;;  %v1997_v4 = vsel %vm4028_vm3, %v1994_v6, %v1991_v42  ;;  %v2000_v47 = vmul.f32 0.6931472, %v2614_v39  ;;  %vm4105_vm7 = vcmp.lt.f32.partialorder %v2031_v36, 0.0004427343 }
 0x2b2   : > { %v4093_v1 = vpop.f32.mrb[27].mxu0  ;;  %v4097_v29 = vadd.f32 %v1988_v51, %v4586_v48  ;;  %v1573_v2 = vpop.permute.xlu1 %1572  ;;  %v2040_v9 = vand.u32 2147483647, %v4037_v33  ;;  %v1845_v51 = vsub.f32 0.0, %v1813_v22  ;;  %v2038_v35 = vadd.f32 1.0, %v2037_v46 }
 0x2b3   : > { %v2620_v15 = vpop.eup %2619  ;;  %v1814_v50 = vand.u32 2147483647, %v4076_v8  ;;  %v4112_v18 = vadd.f32 %v3957_v38, %v1568_v44  ;;  %v4115_v32 = vadd.f32 %v3963_v27, %v1573_v2  ;;  %v2009_v20 = vmul.f32 0.6931472, %v2616_v53  ;;  %v1578_v44 = vpop.permute.xlu0 %1577 }
 0x2b4   : > { %v1892_v42 = vmul.f32 1.442695, %v1845_v51  ;;  %v4119_v36 = vadd.f32 %v3972_v12, %v1573_v2  ;;  %v4589_v39 = vmax.f32 %v3895_v40, 0.0  ;;  %v2018_v46 = vmul.f32 0.6931472, %v2618_v57 }
 0x2b5   : > { %v1846_v48 = vsub.f32 0.0, %v1814_v50  ;;  %v1815_v11 = vand.u32 2147483647, %v4112_v18  ;;  %v2006_v27 = vsel %vm4050_vm4, %v4040_v23, %v2000_v47  ;;  %v2027_v53 = vmul.f32 0.6931472, %v2620_v15  ;;  %v4134_v40 = vpop.eup %2621 }
 0x2b6   : > { %v4123_v22 = vadd.f32 %v1997_v4, %v4589_v39  ;;  %2627 = vpow2.f32 %v1892_v42  ;;  %v1816_v12 = vand.u32 2147483647, %v4115_v32  ;;  %v1817_v51 = vand.u32 2147483647, %v4119_v36 }
 0x2b7   : > { %v4126_v38 = vpop.f32.mrb[28].mxu0  ;;  %v1894_v4 = vmul.f32 1.442695, %v1846_v48  ;;  %v1847_v57 = vsub.f32 0.0, %v1815_v11  ;;  %v4138_v50 = vadd.f32 %v4010_v45, %v1578_v44  ;;  %v2015_v54 = vsel %vm4067_vm5, %v4062_v63, %v2009_v20 }
 0x2b8   : > { %v4132_v2 = vpop.f32.mrb[29].mxu0  ;;  %v2039_v23 = vmul.f32 %v4037_v33, %v2038_v35  ;;  %vm4144_vm8 = vcmp.lt.f32.partialorder %v2040_v9, 0.0004427343  ;;  %v2043_v15 = vadd.f32 1.0, %v4134_v40  ;;  %v1848_v42 = vsub.f32 0.0, %v1816_v12 }
 0x2b9   : > { %v4149_v39 = vpop.f32.mrb[30].mxu0  ;;  %v2024_v45 = vsel %vm4088_vm6, %v4072_v28, %v2018_v46  ;;  %2629 = vpow2.f32 %v1894_v4  ;;  %v1896_v11 = vmul.f32 1.442695, %v1847_v57  ;;  %v1849_v48 = vsub.f32 0.0, %v1817_v51  ;;  %v2624_v63 = vpop.eup %2623 }
 0x2ba   : > { %v4154_v19 = vpop.f32.mrb[31].mxu0  ;;  %v4592_v33 = vmax.f32 %v3899_v10, 0.0  ;;  %2631 = vlog2.f32 %v2043_v15  ;;  %v1898_v20 = vmul.f32 1.442695, %v1848_v42  ;;  %v2626_v12 = vpop.eup %2625  ;;  %v2033_v34 = vsel %vm4105_vm7, %v4100_v43, %v2027_v53 }
 0x2bb   : > { %2633 = vpow2.f32 %v1896_v11  ;;  %v1900_v28 = vmul.f32 1.442695, %v1849_v48  ;;  %v1818_v46 = vand.u32 2147483647, %v4138_v50  ;;  %v4594_v4 = vmax.f32 %v3901_v56, 0.0  ;;  %v1583_v42 = vpop.permute.xlu1 %1582 }
 0x2bc   : > { %v4158_v9 = vadd.f32 %v2006_v27, %v4592_v33  ;;  %v4595_v10 = vmax.f32 %v3904_v58, 0.0  ;;  %v2046_v51 = vmul.f32 -0.5, %v4134_v40  ;;  %v2052_v15 = vadd.f32 1.0, %v2626_v12 }
 0x2bd   : > { %v4167_v57 = vadd.f32 %v2015_v54, %v4594_v4  ;;  %v2036_v33 = vmul.f32 0.6931472, %v2624_v63  ;;  %2635 = vpow2.f32 %v1898_v20  ;;  %v1850_v26 = vsub.f32 0.0, %v1818_v46 }
 0x2be   : > { %4593 = vst [vmem:[#allocation4_spill] sm:$0xff] %v4158_v9  ;;  %v4171_v27 = vadd.f32 %v2024_v45, %v4595_v10  ;;  %v4175_v43 = vadd.f32 %v4018_v30, %v1578_v44  ;;  %v4598_v53 = vmax.f32 %v3907_v25, 0.0  ;;  %2637 = vlog2.f32 %v2052_v15 }
 0x2bf   : > { %v2055_v56 = vmul.f32 -0.5, %v2626_v12  ;;  %v4182_v58 = vadd.f32 %v4024_v16, %v1583_v42  ;;  %v2049_v54 = vand.u32 2147483647, %v4134_v40  ;;  %2639 = vpow2.f32 %v1900_v28 }
 0x2c0   : > { %4596 = vst [vmem:[#allocation2_spill] sm:$0xff] %v4171_v27  ;;  %4597 = vst [vmem:[#allocation6_spill] sm:$0xff] %v4175_v43  ;;  %v4179_v11 = vadd.f32 %v2033_v34, %v4598_v53  ;;  %v1902_v48 = vmul.f32 1.442695, %v1850_v26  ;;  %v2628_v63 = vpop.eup %2627  ;;  %v2047_v20 = vadd.f32 1.0, %v2046_v51  ;;  %v2042_v34 = vsel %vm4144_vm8, %v2039_v23, %v2036_v33 }
 0x2c1   : > { %v1819_v25 = vand.u32 2147483647, %v4175_v43  ;;  %v2061_v46 = vadd.f32 1.0, %v2628_v63  ;;  %v2056_v4 = vadd.f32 1.0, %v2055_v56  ;;  %v2058_v10 = vand.u32 2147483647, %v2626_v12 }
 0x2c2   : > { %2641 = vpow2.f32 %v1902_v48  ;;  %v1820_v28 = vand.u32 2147483647, %v4182_v58  ;;  %vm4193_vm9 = vcmp.lt.f32.partialorder %v2049_v54, 0.0004427343  ;;  %v2064_v53 = vmul.f32 -0.5, %v2628_v63 }
 0x2c3   : > { %v1851_v15 = vsub.f32 0.0, %v1819_v25  ;;  %v2630_v26 = vpop.eup %2629  ;;  %2643 = vlog2.f32 %v2061_v46  ;;  %v4198_v44 = vadd.f32 %v4033_v7, %v1583_v42  ;;  %v4601_v47 = vmax.f32 %v3916_v13, 0.0 }
 0x2c4   : > { %v2632_v23 = vpop.eup %2631  ;;  %v2048_v56 = vmul.f32 %v4134_v40, %v2047_v20  ;;  %v2070_v48 = vadd.f32 1.0, %v2630_v26  ;;  %v2067_v30 = vand.u32 2147483647, %v2628_v63  ;;  %v2073_v45 = vmul.f32 -0.5, %v2630_v26 }
 0x2c5   : > { %v4202_v33 = vadd.f32 %v2042_v34, %v4601_v47  ;;  %v1904_v25 = vmul.f32 1.442695, %v1851_v15  ;;  %v4205_v16 = vpop.eup %2633  ;;  %v2045_v54 = vmul.f32 0.6931472, %v2632_v23  ;;  %v4208_v35 = vmul.f32 %v2626_v12, %v2056_v4 }
 0x2c6   : > { %vm4210_vm10 = vcmp.lt.f32.partialorder %v2058_v10, 0.0004427343  ;;  %2645 = vlog2.f32 %v2070_v48  ;;  %v2079_v13 = vadd.f32 1.0, %v4205_v16  ;;  %v1852_v42 = vsub.f32 0.0, %v1820_v28 }
 0x2c7   : > { %4602 = vst [vmem:[#allocation7_spill] sm:$0xff] %v4202_v33  ;;  %v2636_v40 = vpop.eup %2635  ;;  %v2065_v20 = vadd.f32 1.0, %v2064_v53  ;;  %2647 = vpow2.f32 %v1904_v25  ;;  %v1821_v15 = vand.u32 2147483647, %v4198_v44  ;;  %v2076_v47 = vand.u32 2147483647, %v2630_v26 }
 0x2c8   : > { %v2638_v23 = vpop.eup %2637  ;;  %2649 = vlog2.f32 %v2079_v13  ;;  %v2088_v12 = vadd.f32 1.0, %v2636_v40  ;;  %v2051_v48 = vsel %vm4193_vm9, %v2048_v56, %v2045_v54  ;;  %vm4220_vm11 = vcmp.lt.f32.partialorder %v2067_v30, 0.0004427343 }
 0x2c9   : > { %v2640_v10 = vpop.eup %2639  ;;  %v2074_v28 = vadd.f32 1.0, %v2073_v45  ;;  %v2082_v53 = vmul.f32 -0.5, %v4205_v16  ;;  %v4226_v25 = vmul.f32 0.6931472, %v4026_v61  ;;  %v2085_v34 = vand.u32 2147483647, %v4205_v16 }
 0x2ca   : > { %2651 = vlog2.f32 %v2088_v12  ;;  %v2097_v13 = vadd.f32 1.0, %v2640_v10  ;;  %v1906_v6 = vmul.f32 1.442695, %v1852_v42  ;;  %v2054_v33 = vmul.f32 0.6931472, %v2638_v23 }
 0x2cb   : > { %v2066_v43 = vmul.f32 %v2628_v63, %v2065_v20  ;;  %v2091_v51 = vmul.f32 -0.5, %v2636_v40  ;;  %v1853_v56 = vsub.f32 0.0, %v1821_v15  ;;  %v4607_v30 = vand.u32 2147483647, %v3913_v31 }
 0x2cc   : > { %v2642_v4 = vpop.eup %2641  ;;  %v4610_v45 = vmax.f32 %v3978_v37, 0.0  ;;  %vm4239_vm13 = vcmp.lt.f32.partialorder %v2076_v47, 0.0004427343  ;;  %2653 = vlog2.f32 %v2097_v13  ;;  %v2100_v42 = vmul.f32 -0.5, %v2640_v10 }
 0x2cd   : > { %vm4231_vm12 = vcmp.lt.f32.partialorder %v4607_v30, 0.0004427343  ;;  %v2644_v23 = vpop.eup %2643  ;;  %v2075_v63 = vmul.f32 %v2630_v26, %v2074_v28  ;;  %v2083_v20 = vadd.f32 1.0, %v2082_v53  ;;  %v2106_v15 = vadd.f32 1.0, %v2642_v4 }
 0x2ce   : > { %v4237_v61 = vadd.f32 %v2051_v48, %v4610_v45  ;;  %v2109_v12 = vmul.f32 -0.5, %v2642_v4  ;;  %v2063_v31 = vmul.f32 0.6931472, %v2644_v23  ;;  %vm4243_vm14 = vcmp.lt.f32.partialorder %v2085_v34, 0.0004427343 }
 0x2cf   : > { %v2094_v9 = vand.u32 2147483647, %v2636_v40  ;;  %2655 = vpow2.f32 %v1906_v6  ;;  %v2060_v37 = vsel %vm4210_vm10, %v4208_v35, %v2054_v33  ;;  %v2092_v47 = vadd.f32 1.0, %v2091_v51 }
 0x2d0   : > { %4611 = vst [vmem:[#allocation8_spill] sm:$0xff] %v4237_v61  ;;  %2657 = vlog2.f32 %v2106_v15  ;;  %v1908_v48 = vmul.f32 1.442695, %v1853_v56  ;;  %v2646_v13 = vpop.eup %2645  ;;  %v2101_v45 = vadd.f32 1.0, %v2100_v42  ;;  %v2103_v26 = vand.u32 2147483647, %v2640_v10 }
 0x2d1   : > { %2659 = vlog2.f32 %v3966_v60  ;;  %v1956_v28 = vmul.f32 -0.5, %v3943_v3  ;;  %v4252_v34 = vpop.eup %2647  ;;  %v2072_v53 = vmul.f32 0.6931472, %v2646_v13  ;;  %v2110_v23 = vadd.f32 1.0, %v2109_v12 }
 0x2d2   : > { %v2112_v61 = vand.u32 2147483647, %v2642_v4  ;;  %2661 = vpow2.f32 %v1908_v48  ;;  %v2650_v6 = vpop.eup %2649  ;;  %v2069_v35 = vsel %vm4220_vm11, %v2066_v43, %v2063_v31  ;;  %v2084_v33 = vmul.f32 %v4205_v16, %v2083_v20 }
 0x2d3   : > { %v2115_v7 = vadd.f32 1.0, %v4252_v34  ;;  %v2118_v51 = vmul.f32 -0.5, %v4252_v34  ;;  %v4616_v60 = vmax.f32 %v3997_v59, 0.0  ;;  %v2081_v42 = vmul.f32 0.6931472, %v2650_v6 }
 0x2d4   : > { %v2093_v15 = vmul.f32 %v2636_v40, %v2092_v47  ;;  %vm4263_vm15 = vcmp.lt.f32.partialorder %v2094_v9, 0.0004427343  ;;  %v2652_v48 = vpop.eup %2651  ;;  %v2102_v13 = vmul.f32 %v2640_v10, %v2101_v45  ;;  %vm4267_vm0 = vcmp.lt.f32.partialorder %v2103_v26, 0.0004427343 }
 0x2d5   : > { %v4261_v56 = vadd.f32 %v2060_v37, %v4616_v60  ;;  %v1943_v16 = vsel %vm4231_vm12, %v3981_v24, %v4226_v25  ;;  %v1957_v59 = vadd.f32 1.0, %v1956_v28  ;;  %v4621_v46 = vmax.f32 %v4055_v49, 0.0 }
 0x2d6   : > { %v2078_v9 = vsel %vm4239_vm13, %v2075_v63, %v2072_v53  ;;  %v2111_v40 = vmul.f32 %v2642_v4, %v2110_v23  ;;  %vm4281_vm1 = vcmp.lt.f32.partialorder %v2112_v61, 0.0004427343  ;;  %v1959_v31 = vand.u32 2147483647, %v3943_v3  ;;  %v2654_v37 = vpop.eup %2653 }
 0x2d7   : > { %v4277_v20 = vadd.f32 %v2069_v35, %v4621_v46  ;;  %v2090_v47 = vmul.f32 0.6931472, %v2652_v48  ;;  %2663 = vlog2.f32 %v2115_v7  ;;  %v2119_v54 = vadd.f32 1.0, %v2118_v51 }
 0x2d8   : > { %v1926_v24 = vadd.f32 1.0, %v3952_v17  ;;  %v2087_v49 = vsel %vm4243_vm14, %v2084_v33, %v2081_v42  ;;  %v2121_v25 = vand.u32 2147483647, %v4252_v34  ;;  %v4624_v27 = vmax.f32 %v3875_v14, 0.0 }
 0x2d9   : > { %v1929_v61 = vmul.f32 -0.5, %v3952_v17  ;;  %v2656_v63 = vpop.eup %2655  ;;  %v4625_v45 = vmax.f32 %v4076_v8, 0.0  ;;  %v2099_v28 = vmul.f32 0.6931472, %v2654_v37  ;;  %v1958_v53 = vmul.f32 %v3943_v3, %v1957_v59 }
 0x2da   : > { %v2215_v4 = vadd.f32 %v1943_v16, %v4624_v27  ;;  %2665 = vlog2.f32 %v1926_v24  ;;  %v2658_v23 = vpop.eup %2657  ;;  %v2124_v6 = vadd.f32 1.0, %v2656_v63  ;;  %v2127_v30 = vmul.f32 -0.5, %v2656_v63 }
 0x2db   : > { %v4295_v26 = vadd.f32 %v2078_v9, %v4625_v45  ;;  %vm4298_vm2 = vcmp.lt.f32.partialorder %v1959_v31, 0.0004427343  ;;  %v1944_v14 = vadd.f32 1.0, %v3960_v55  ;;  %v2660_v33 = vpop.eup %2659  ;;  %v4628_v7 = vmax.f32 %v4112_v18, 0.0 }
 0x2dc   : > { %v2096_v8 = vsel %vm4263_vm15, %v2093_v15, %v2090_v47  ;;  %v2108_v60 = vmul.f32 0.6931472, %v2658_v23  ;;  %v4310_v3 = vmul.f32 %v4252_v34, %v2119_v54  ;;  %v2662_v42 = vpop.eup %2661  ;;  %2667 = vlog2.f32 %v2124_v6  ;;  %v1588_v34 = vpop.permute.xlu0 %1587 }
 0x2dd   : > { %v4305_v51 = vadd.f32 %v2087_v49, %v4628_v7  ;;  %v1955_v48 = vmul.f32 0.6931472, %v2660_v33  ;;  %v1930_v16 = vadd.f32 1.0, %v1929_v61  ;;  %v1932_v59 = vand.u32 2147483647, %v3952_v17 }
 0x2de   : > { %v2105_v46 = vsel %vm4267_vm0, %v2102_v13, %v2099_v28  ;;  %v2130_v9 = vand.u32 2147483647, %v2656_v63  ;;  %v2133_v18 = vadd.f32 1.0, %v2662_v42  ;;  %v1947_v31 = vmul.f32 -0.5, %v3960_v55  ;;  %v1593_v13 = vpop.permute.xlu1 %1592 }
 0x2df   : > { %v2128_v37 = vadd.f32 1.0, %v2127_v30  ;;  %v2136_v12 = vmul.f32 -0.5, %v2662_v42  ;;  %v1961_v15 = vsel %vm4298_vm2, %v1958_v53, %v1955_v48  ;;  %2669 = vlog2.f32 %v1944_v14 }
 0x2e0   : > { %v2114_v47 = vsel %vm4281_vm1, %v2111_v40, %v2108_v60  ;;  %2671 = vlog2.f32 %v2133_v18  ;;  %v2139_v54 = vand.u32 2147483647, %v2662_v42  ;;  %v4629_v24 = vmax.f32 %v3878_v52, 0.0 }
 0x2e1   : > { %v4630_v49 = vmax.f32 %v4115_v32, 0.0  ;;  %v4631_v61 = vmax.f32 %v4119_v36, 0.0  ;;  %v1931_v28 = vmul.f32 %v3952_v17, %v1930_v16  ;;  %v4332_v53 = vadd.f32 %v4057_v41, %v1588_v34  ;;  %v2664_v40 = vpop.eup %2663  ;;  %v4643_v41 = vld [vmem:[#allocation5_spill] sm:$0xff] }
 0x2e2   : > { %v2217_v43 = vadd.f32 %v1961_v15, %v4629_v24  ;;  %vm4334_vm3 = vcmp.lt.f32.partialorder %v1932_v59, 0.0004427343  ;;  %v4339_v52 = vadd.f32 %v4065_v0, %v1588_v34  ;;  %v4342_v32 = vadd.f32 %v4078_v62, %v1593_v13 }
 0x2e3   : > { %v4324_v27 = vadd.f32 %v2096_v8, %v4630_v49  ;;  %v4328_v45 = vadd.f32 %v2105_v46, %v4631_v61  ;;  %v4634_v36 = vmax.f32 %v4138_v50, 0.0  ;;  %vm4348_vm4 = vcmp.lt.f32.partialorder %v2121_v25, 0.0004427343 }
 0x2e4   : > { %v2248_v10 = vpack.c.bf16 %v2217_v43, %v2215_v4  ;;  %vm4352_vm5 = vcmp.lt.f32.partialorder %v2130_v9, 0.0004427343  ;;  %v2137_v4 = vadd.f32 1.0, %v2136_v12  ;;  %v1950_v30 = vand.u32 2147483647, %v3960_v55  ;;  %v2666_v0 = vpop.eup %2665  ;;  %v1598_v12 = vpop.permute.xlu0 %1597 }
 0x2e5   : > { %v4346_v6 = vadd.f32 %v2114_v47, %v4634_v36  ;;  %v2129_v35 = vmul.f32 %v2656_v63, %v2128_v37  ;;  %vm4357_vm6 = vcmp.lt.f32.partialorder %v2139_v54, 0.0004427343  ;;  %v1948_v50 = vadd.f32 1.0, %v1947_v31 }
 0x2e6   : > { %2269 = vmatprep.subr.bf16.mxu1 %v2248_v10  ;;  %v1822_v25 = vand.u32 2147483647, %v4332_v53  ;;  %v1823_v14 = vand.u32 2147483647, %v4339_v52  ;;  %v2117_v33 = vmul.f32 0.6931472, %v2664_v40  ;;  %v4365_v60 = vadd.f32 %v4093_v1, %v1593_v13  ;;  %v2668_v46 = vpop.eup %2667  ;;  %v1603_v13 = vpop.permute.xlu1 %1602 }
 0x2e7   : > { %v1928_v7 = vmul.f32 0.6931472, %v2666_v0  ;;  %v1824_v8 = vand.u32 2147483647, %v4342_v32  ;;  %v2250_v63 = vpack.c.bf16 %v4123_v22, %v4086_v5  ;;  %v2249_v59 = vpack.c.bf16 %v4097_v29, %v4082_v21  ;;  %v4645_v0 = vld [vmem:[#allocation3_spill] sm:$0xff] }
 0x2e8   : > { %v1854_v48 = vsub.f32 0.0, %v1822_v25  ;;  %v1855_v16 = vsub.f32 0.0, %v1823_v14  ;;  %v2138_v9 = vmul.f32 %v2662_v42, %v2137_v4  ;;  %vm4371_vm7 = vcmp.lt.f32.partialorder %v1950_v30, 0.0004427343 }
 0x2e9   : > { %v1856_v31 = vsub.f32 0.0, %v1824_v8  ;;  %v1825_v37 = vand.u32 2147483647, %v4365_v60  ;;  %v2126_v1 = vmul.f32 0.6931472, %v2668_v46  ;;  %v1949_v15 = vmul.f32 %v3960_v55, %v1948_v50  ;;  %v2670_v54 = vpop.eup %2669  ;;  %v4649_v46 = vld [vmem:[#allocation4_spill] sm:$0xff] }
 0x2ea   : > { %v1910_v34 = vmul.f32 1.442695, %v1854_v48  ;;  %v1912_v47 = vmul.f32 1.442695, %v1855_v16  ;;  %v1934_v5 = vsel %vm4334_vm3, %v1931_v28, %v1928_v7  ;;  %v4380_v42 = vadd.f32 %v4126_v38, %v1598_v12  ;;  %v2672_v43 = vpop.eup %2671 }
 0x2eb   : > { %v1914_v22 = vmul.f32 1.442695, %v1856_v31  ;;  %v1857_v24 = vsub.f32 0.0, %v1825_v37  ;;  %v2132_v49 = vsel %vm4352_vm5, %v2129_v35, %v2126_v1  ;;  %v1946_v61 = vmul.f32 0.6931472, %v2670_v54  ;;  %v4652_v37 = vld [vmem:[#allocation6_spill] sm:$0xff] }
 0x2ec   : > { %2673 = vpow2.f32 %v1910_v34  ;;  %v4385_v55 = vadd.f32 %v4132_v2, %v1598_v12  ;;  %v2135_v40 = vmul.f32 0.6931472, %v2672_v43  ;;  %v4388_v28 = vadd.f32 %v4149_v39, %v1603_v13  ;;  %v4654_v34 = vld [vmem:[#allocation7_spill] sm:$0xff] }
 0x2ed   : > { %2675 = vpow2.f32 %v1912_v47  ;;  %v1916_v10 = vmul.f32 1.442695, %v1857_v24  ;;  %v2123_v38 = vsel %vm4348_vm4, %v4310_v3, %v2117_v33  ;;  %v1952_v23 = vsel %vm4371_vm7, %v1949_v15, %v1946_v61 }
 0x2ee   : > { %2677 = vpow2.f32 %v1914_v22  ;;  %v1826_v36 = vand.u32 2147483647, %v4380_v42  ;;  %v2141_v2 = vsel %vm4357_vm6, %v2138_v9, %v2135_v40  ;;  %v4644_v4 = vmax.f32 %v4643_v41, 0.0  ;;  %v4650_v9 = vld [vmem:[#allocation2_spill] sm:$0xff] }
 0x2ef   : > { %v4646_v35 = vmax.f32 %v4645_v0, 0.0  ;;  %2679 = vpow2.f32 %v1916_v10  ;;  %v4647_v50 = vmax.f32 %v4182_v58, 0.0  ;;  %v4648_v3 = vmax.f32 %v4198_v44, 0.0  ;;  %v4651_v44 = vld [vmem:[#allocation8_spill] sm:$0xff] }
 0x2f0   : > { %v2214_v30 = vadd.f32 %v1934_v5, %v4644_v4  ;;  %v1858_v14 = vsub.f32 0.0, %v1826_v36  ;;  %v1827_v33 = vand.u32 2147483647, %v4385_v55  ;;  %v1828_v7 = vand.u32 2147483647, %v4388_v28 }
 0x2f1   : > { %v2216_v39 = vadd.f32 %v1952_v23, %v4646_v35  ;;  %v4404_v17 = vadd.f32 %v2132_v49, %v4647_v50  ;;  %v4408_v25 = vadd.f32 %v2141_v2, %v4648_v3  ;;  %v4413_v8 = vadd.f32 %v4154_v19, %v1603_v13 }
 0x2f2   : > { %v2252_v48 = vpack.c.bf16 %v4179_v11, %v4167_v57  ;;  %v1918_v16 = vmul.f32 1.442695, %v1858_v14  ;;  %v1859_v58 = vsub.f32 0.0, %v1827_v33  ;;  %v2251_v18 = vpack.c.bf16 %v4650_v9, %v4649_v46 }
 0x2f3   : > { %v2247_v62 = vpack.c.bf16 %v2216_v39, %v2214_v30  ;;  %v2254_v31 = vpack.c.bf16 %v4277_v20, %v4651_v44  ;;  %v4653_v12 = vmax.f32 %v4652_v37, 0.0  ;;  %v1860_v15 = vsub.f32 0.0, %v1828_v7 }
 0x2f4   : > { %v1829_v19 = vand.u32 2147483647, %v4413_v8  ;;  %v2253_v47 = vpack.c.bf16 %v4261_v56, %v4654_v34  ;;  %2681 = vpow2.f32 %v1918_v16  ;;  %v1920_v57 = vmul.f32 1.442695, %v1859_v58 }
 0x2f5   : > { %v4423_v1 = vadd.f32 %v2123_v38, %v4653_v12  ;;  %2270 = vmatpush1.bf16.msra.mxu1 %v2247_v62  ;;  %v2256_v11 = vpack.c.bf16 %v4328_v45, %v4305_v51  ;;  %v2255_v20 = vpack.c.bf16 %v4324_v27, %v4295_v26  ;;  %v1922_v54 = vmul.f32 1.442695, %v1860_v15 }
 0x2f6   : > { %2271 = vmatprep.subr.bf16.mxu1 %v2250_v63  ;;  %v2257_v22 = vpack.c.bf16 %v4404_v17, %v4346_v6  ;;  %v2674_v24 = vpop.eup %2673  ;;  %2683 = vpow2.f32 %v1920_v57  ;;  %v1861_v43 = vsub.f32 0.0, %v1829_v19  ;;  %v1790_v2 = vmax.f32 %v4332_v53, 0.0 }
 0x2f7   : > { %v2258_v5 = vpack.c.bf16 %v4408_v25, %v4423_v1  ;;  %v2676_v56 = vpop.eup %2675  ;;  %v2142_v63 = vadd.f32 1.0, %v2674_v24  ;;  %2685 = vpow2.f32 %v1922_v54  ;;  %v2145_v61 = vmul.f32 -0.5, %v2674_v24 }
 0x2f8   : > { %v2678_v51 = vpop.eup %2677  ;;  %v2151_v45 = vadd.f32 1.0, %v2676_v56  ;;  %v1924_v13 = vmul.f32 1.442695, %v1861_v43  ;;  %v2154_v21 = vmul.f32 -0.5, %v2676_v56  ;;  %v1791_v41 = vmax.f32 %v4339_v52, 0.0 }
 0x2f9   : > { %2272 = vmatpush1.bf16.msra.mxu1 %v2249_v59  ;;  %v4439_v26 = vpop.eup %2679  ;;  %2687 = vlog2.f32 %v2142_v63  ;;  %v2160_v27 = vadd.f32 1.0, %v2678_v51  ;;  %v2163_v29 = vmul.f32 -0.5, %v2678_v51  ;;  %v2146_v38 = vadd.f32 1.0, %v2145_v61 }
 0x2fa   : > { %2273 = vmatprep.subr.bf16.mxu1 %v2252_v48  ;;  %2689 = vlog2.f32 %v2151_v45  ;;  %v2169_v49 = vadd.f32 1.0, %v4439_v26  ;;  %v2172_v23 = vmul.f32 -0.5, %v4439_v26  ;;  %v2148_v30 = vand.u32 2147483647, %v2674_v24 }
 0x2fb   : > { %2691 = vlog2.f32 %v2160_v27  ;;  %v2155_v0 = vadd.f32 1.0, %v2154_v21  ;;  %v2164_v35 = vadd.f32 1.0, %v2163_v29  ;;  %v2157_v3 = vand.u32 2147483647, %v2676_v56 }
 0x2fc   : > { %2693 = vlog2.f32 %v2169_v49  ;;  %v1792_v25 = vmax.f32 %v4342_v32, 0.0  ;;  %v2166_v14 = vand.u32 2147483647, %v2678_v51  ;;  %v1793_v33 = vmax.f32 %v4365_v60, 0.0 }
 0x2fd   : > { %2274 = vmatpush1.bf16.msra.mxu1 %v2251_v18  ;;  %2695 = vpow2.f32 %v1924_v13  ;;  %v2147_v7 = vmul.f32 %v2674_v24, %v2146_v38  ;;  %v2173_v52 = vadd.f32 1.0, %v2172_v23  ;;  %v2175_v58 = vand.u32 2147483647, %v4439_v26 }
 0x2fe   : > { %2275 = vmatprep.subr.bf16.mxu1 %v2254_v31  ;;  %v4442_v40 = vpop.eup %2681  ;;  %vm4458_vm8 = vcmp.lt.f32.partialorder %v2148_v30, 0.0004427343  ;;  %v2156_v32 = vmul.f32 %v2676_v56, %v2155_v0  ;;  %v2165_v18 = vmul.f32 %v2678_v51, %v2164_v35  ;;  %vm4464_vm9 = vcmp.lt.f32.partialorder %v2157_v3, 0.0004427343 }
 0x2ff   : > { %v2178_v59 = vadd.f32 1.0, %v4442_v40  ;;  %v2181_v46 = vmul.f32 -0.5, %v4442_v40  ;;  %vm2167_vm10 = vcmp.lt.f32.partialorder %v2166_v14, 0.0004427343  ;;  %vm2176_vm11 = vcmp.lt.f32.partialorder %v2175_v58, 0.0004427343 }
 0x300   : > { %v4445_v10 = vpop.eup %2683  ;;  %v2184_v24 = vand.u32 2147483647, %v4442_v40  ;;  %v1794_v38 = vmax.f32 %v4380_v42, 0.0 }
 0x301   : > { %2276 = vmatpush1.bf16.msra.mxu1 %v2253_v47  ;;  %v4448_v36 = vpop.eup %2685  ;;  %2697 = vlog2.f32 %v2178_v59  ;;  %v2187_v4 = vadd.f32 1.0, %v4445_v10  ;;  %v2174_v47 = vmul.f32 %v4439_v26, %v2173_v52  ;;  %v2190_v63 = vmul.f32 -0.5, %v4445_v10 }
 0x302   : > { %2277 = vmatprep.subr.bf16.mxu1 %v2256_v11  ;;  %v2196_v39 = vadd.f32 1.0, %v4448_v36  ;;  %v2199_v12 = vmul.f32 -0.5, %v4448_v36  ;;  %v2182_v11 = vadd.f32 1.0, %v2181_v46  ;;  %v2202_v51 = vand.u32 2147483647, %v4448_v36 }
 0x303   : > { %v2688_v50 = vpop.eup %2687  ;;  %vm2185_vm12 = vcmp.lt.f32.partialorder %v2184_v24, 0.0004427343  ;;  %v2191_v23 = vadd.f32 1.0, %v2190_v63 }
 0x304   : > { %v2690_v62 = vpop.eup %2689  ;;  %v2144_v53 = vmul.f32 0.6931472, %v2688_v50  ;;  %2699 = vlog2.f32 %v2196_v39  ;;  %v2200_v17 = vadd.f32 1.0, %v2199_v12  ;;  %v2183_v26 = vmul.f32 %v4442_v40, %v2182_v11 }
 0x305   : > { %2278 = vmatpush1.bf16.msra.mxu1 %v2255_v20  ;;  %v2692_v48 = vpop.eup %2691  ;;  %v2153_v16 = vmul.f32 0.6931472, %v2690_v62  ;;  %2701 = vlog2.f32 %v2187_v4  ;;  %vm2203_vm13 = vcmp.lt.f32.partialorder %v2202_v51, 0.0004427343  ;;  %v2192_v50 = vmul.f32 %v4445_v10, %v2191_v23 }
 0x306   : > { %2279 = vmatprep.subr.bf16.mxu1 %v2258_v5  ;;  %v2162_v60 = vmul.f32 0.6931472, %v2692_v48  ;;  %v2694_v44 = vpop.eup %2693  ;;  %v2150_v31 = vsel %vm4458_vm8, %v2147_v7, %v2144_v53  ;;  %v2201_v59 = vmul.f32 %v4448_v36, %v2200_v17  ;;  %v2267_v48 = vpop.permute.xlu0 %2266 }
 0x307   : > { %v2696_v1 = vpop.eup %2695  ;;  %v2159_v15 = vsel %vm4464_vm9, %v2156_v32, %v2153_v16  ;;  %v2171_v34 = vmul.f32 0.6931472, %v2694_v44  ;;  %v2238_v54 = vadd.f32 %v2150_v31, %v1790_v2  ;;  %v1796_v2 = vmax.f32 %v4388_v28, 0.0 }
 0x308   : > { %v2168_v19 = vsel %vm2167_vm10, %v2165_v18, %v2162_v60  ;;  %v2205_v20 = vadd.f32 1.0, %v2696_v1  ;;  %v2239_v56 = vadd.f32 %v2159_v15, %v1791_v41  ;;  %v2208_v49 = vmul.f32 -0.5, %v2696_v1 }
 0x309   : > { %2280 = vmatpush1.bf16.msra.mxu1 %v2257_v22  ;;  %v2240_v57 = vadd.f32 %v2168_v19, %v1792_v25  ;;  %v2177_v5 = vsel %vm2176_vm11, %v2174_v47, %v2171_v34  ;;  %v2193_v41 = vand.u32 2147483647, %v4445_v10  ;;  %v2211_v39 = vand.u32 2147483647, %v2696_v1  ;;  %v2246_v10 = vld [vmem:[%s4501_s5] sm:$0xf] }
 0x30a   : > { %v2241_v6 = vadd.f32 %v2177_v5, %v1793_v33  ;;  %2703 = vlog2.f32 %v2205_v20  ;;  %v2209_v35 = vadd.f32 1.0, %v2208_v49  ;;  %v1795_v28 = vmax.f32 %v4385_v55, 0.0 }
 0x30b   : > { %v2698_v43 = vpop.eup %2697  ;;  %v2259_v45 = vpack.c.bf16 %v2240_v57, %v2238_v54  ;;  %vm2194_vm14 = vcmp.lt.f32.partialorder %v2193_v41, 0.0004427343  ;;  %v1797_v33 = vmax.f32 %v4413_v8, 0.0  ;;  %vm2212_vm15 = vcmp.lt.f32.partialorder %v2211_v39, 0.0004427343 }
 0x30c   : > { %v2180_v22 = vmul.f32 0.6931472, %v2698_v43  ;;  %v2260_v27 = vpack.c.bf16 %v2241_v6, %v2239_v56  ;;  %v2210_v14 = vmul.f32 %v2696_v1, %v2209_v35 }
 0x30e   : > { %v2700_v13 = vpop.eup %2699  ;;  %v2186_v21 = vsel %vm2185_vm12, %v2183_v26, %v2180_v22  ;;  %2281 = vmatprep.subr.bf16.mxu1 %v2260_v27 }
 0x30f   : > { %v2702_v61 = vpop.eup %2701  ;;  %v2198_v29 = vmul.f32 0.6931472, %v2700_v13  ;;  %2282 = vmatpush1.bf16.msra.mxu1 %v2259_v45  ;;  %v2242_v4 = vadd.f32 %v2186_v21, %v1794_v38 }
 0x310   : > { %v2189_v30 = vmul.f32 0.6931472, %v2702_v61 }
 0x311   : > { %v2204_v40 = vsel %vm2203_vm13, %v2201_v59, %v2198_v29 }
 0x312   : > { %v2244_v0 = vadd.f32 %v2204_v40, %v1796_v2  ;;  %v2195_v42 = vsel %vm2194_vm14, %v2192_v50, %v2189_v30 }
 0x313   : > { %v2243_v53 = vadd.f32 %v2195_v42, %v1795_v28 }
 0x314   : > { %v2261_v3 = vpack.c.bf16 %v2244_v0, %v2242_v4  ;;  %v2704_v36 = vpop.eup %2703 }
 0x315   : > { %v2207_v25 = vmul.f32 0.6931472, %v2704_v36 }
 0x317   : > { %v2213_v62 = vsel %vm2212_vm15, %v2210_v14, %v2207_v25 }
 0x318   : > { %v2245_v7 = vadd.f32 %v2213_v62, %v1797_v33 }
 0x31a   : > { %v2262_v52 = vpack.c.bf16 %v2245_v7, %v2243_v53 }
 0x31c   : > { %2283 = vmatprep.subr.bf16.mxu1 %v2262_v52 }
 0x31d   : > { %2284 = vmatpush1.bf16.msra.mxu1 %v2261_v3 }
 0x320   : > { %2302 = vmatmul.mubr.bf16.vlgmr.msra.gmra.mrb[0].mxu1 %v2246_v10 }
 0x3f3   : > { %v2303_v55 = vpop.f32.mrb[0].mxu1 }
 0x3f4   : > { %v2304_v8 = vadd.f32 %v2303_v55, %v2267_v48  ;;  %v2305_v16 = vpop.f32.mrb[1].mxu1 }
 0x3f5   : > { %v2306_v58 = vadd.f32 %v2305_v16, %v2267_v48  ;;  %v2307_v46 = vpop.f32.mrb[2].mxu1 }
 0x3f6   : > { %2310 = vst [vmem:[%s280_s21] sm:$0xff] %v2304_v8  ;;  %v2308_v9 = vpop.f32.mrb[3].mxu1 }
 0x3f7   : > { %2311 = vst [vmem:[%s280_s21 + $0x8] sm:$0xff] %v2306_v58 }
 0x3f8 PF: > { %s17_s24 = sadd.s32 1, %s2711_s24  }
 0x3f9   : > { %p14_p4 = scmp.ge.s32.totalorder %s17_s24, 4  }
 0x3fb   :  { %16 = sbr.rel (!%p14_p4) target bundleno = 1 (0x1), region = 78 }

</bundles_post_ra>
